<compile_context>
chip_gen: v7x
topology: tpu7x:2x2x1
jax: 0.10.0
libtpu: 0.0.40
codegen_flags: <defaults>
</compile_context>

<pallas_src>
import functools

import jax
import jax.numpy as jnp
from jax.experimental import pallas as pl
from jax.experimental.pallas import tpu as pltpu


# ------------------------------ small helpers -------------------------------

def bn_fold(gamma, beta, mean, var, eps=1e-5):
    """Fold inference-mode BatchNorm into (scale, bias)."""
    s = gamma / jnp.sqrt(var + eps)
    return s, beta - mean * s


def _bn_pack(bn):
    s, b = bn_fold(*bn)
    return jnp.stack([s, b], axis=0).astype(jnp.float32)          # (2, C)


def channel_shuffle_nhwc(x, groups):
    n, h, w, c = x.shape
    return (x.reshape(n, h, w, groups, c // groups)
             .transpose(0, 1, 2, 4, 3)
             .reshape(n, h, w, c))


def _pick_block_rows(ho, limit=32):
    best = 1
    for t in range(1, min(ho, limit) + 1):
        if ho % t == 0:
            best = t
    return best


def _build_slabs(x_nhwc, ho):
    """(N,H,W,C) -> (N, Ho, 3, Wp, C): the 3 zero-padded input rows feeding each
    output row, with every row's columns reordered [even cols | odd cols] so all
    3x3/stride-2 taps become contiguous length-Wo slices inside the kernel."""
    xp = jnp.pad(x_nhwc, ((0, 0), (1, 1), (1, 1), (0, 0)))
    rows = jnp.stack([xp[:, r:r + 2 * ho - 1:2] for r in range(3)], axis=2)
    return jnp.concatenate([rows[:, :, :, 0::2], rows[:, :, :, 1::2]], axis=3)


# ------------------------------ fused kernel --------------------------------

def _down_block_kernel(wp, we, wo, toh, cin, mid,
                       xr_ref, ms_ref,
                       dwl_ref, bnldw_ref, wlpw_ref, bnlpw_ref,
                       w1_ref, bn1_ref, dwr_ref, bnrdw_ref, w2_ref, bn2_ref,
                       o_ref,
                       t_ref, dl_ref, dr_ref):
    """One (image, row-block) tile of the whole DownBlock.

    xr_ref : (R, cin) bf16 row slab, R = toh*3*wp, row index = (i*3 + r)*wp + col
    ms_ref : (R, 1)   1.0 at valid pixels, 0.0 at conv-padding positions
    o_ref  : (toh*wo, 2*mid)  [left | right] (concat order, shuffle done outside)
    """
    f32 = jnp.float32

    # ---- right branch 1x1 conv + BN + ReLU over the whole slab (1 MXU matmul,
    #      bf16 operands, f32 accumulation), then zero the padding positions ----
    z = jnp.dot(xr_ref[...], w1_ref[...], preferred_element_type=f32)   # (R, mid)
    t = jnp.maximum(z * bn1_ref[0:1, :] + bn1_ref[1:2, :], 0.0)
    t_ref[...] = t * ms_ref[...].astype(f32)

    dwl = dwl_ref[...].astype(f32)            # (9, cin)   depthwise taps, left
    dwr = dwr_ref[...].astype(f32)            # (9, mid)   depthwise taps, right
    col_off = (0, we, 1)                      # kj -> column offset (parity split)

    def dw_row(i):
        """3x3/stride-2 depthwise for one output row, 9 unrolled FMAs/branch."""
        row0 = i * (3 * wp)
        accl = jnp.zeros((wo, cin), f32)
        accr = jnp.zeros((wo, mid), f32)
        for r in range(3):
            for kj in range(3):
                k = r * 3 + kj
                base = row0 + r * wp + col_off[kj]
                accl = accl + xr_ref[pl.ds(base, wo), :].astype(f32) * dwl[k:k + 1, :]
                accr = accr + t_ref[pl.ds(base, wo), :] * dwr[k:k + 1, :]
        dl_ref[pl.ds(i * wo, wo), :] = accl
        dr_ref[pl.ds(i * wo, wo), :] = accr

    if toh <= 8:                               # short fixed trip count: unroll
        for i in range(toh):
            dw_row(i)
    else:                                      # larger row blocks: fori_loop
        def body(i, carry):
            dw_row(i)
            return carry
        jax.lax.fori_loop(0, toh, body, 0)

    # ---- post-depthwise BN, 1x1 conv + BN + ReLU for both branches,
    #      written as a fused [left | right] concat into one output slab ----
    dl = dl_ref[...] * bnldw_ref[0:1, :] + bnldw_ref[1:2, :]
    left = jnp.dot(dl, wlpw_ref[...].astype(f32), preferred_element_type=f32)
    left = jnp.maximum(left * bnlpw_ref[0:1, :] + bnlpw_ref[1:2, :], 0.0)

    dr = dr_ref[...] * bnrdw_ref[0:1, :] + bnrdw_ref[1:2, :]
    right = jnp.dot(dr, w2_ref[...].astype(f32), preferred_element_type=f32)
    right = jnp.maximum(right * bn2_ref[0:1, :] + bn2_ref[1:2, :], 0.0)

    o_ref[:, 0:mid] = left
    o_ref[:, mid:2 * mid] = right


# ------------------------------- JAX wrapper ---------------------------------

def down_block_forward(x_nchw, params, groups=2, block_rows=None,
                       act_dtype=jnp.bfloat16):
    x = jnp.transpose(x_nchw, (0, 2, 3, 1)).astype(jnp.float32)   # NCHW -> NHWC
    n, h, w, cin = x.shape
    ho, wo = (h - 1) // 2 + 1, (w - 1) // 2 + 1
    wp = w + 2                              # padded width
    we = (wp + 1) // 2                      # number of even columns
    mid = params['right_pw2_w'].shape[1]
    cout = 2 * mid

    toh = block_rows if block_rows is not None else _pick_block_rows(ho)
    if ho % toh:
        toh = _pick_block_rows(ho, limit=toh)
    nhb = ho // toh
    r_rows = toh * 3 * wp                   # slab rows per grid step

    # Activation row slab (bf16) + padding-validity mask, tiled per row block.
    xs = _build_slabs(x, ho).astype(act_dtype).reshape(n, nhb, r_rows, cin)
    valid = jnp.ones((n, h, w, 1), jnp.float32)
    ms = _build_slabs(valid, ho).astype(act_dtype).reshape(n, nhb, r_rows, 1)

    # Weights: 1x1 convs in bf16 (MXU), depthwise + folded BN in f32 (tiny).
    w1 = params['right_pw1_w'].astype(act_dtype)
    wl = params['left_pw_w'].astype(act_dtype)
    w2 = params['right_pw2_w'].astype(act_dtype)
    dwl = params['left_dw_w'].astype(jnp.float32)
    dwr = params['right_dw_w'].astype(jnp.float32)
    bnldw = _bn_pack(params['left_dw_bn'])
    bnlpw = _bn_pack(params['left_pw_bn'])
    bn1 = _bn_pack(params['right_pw1_bn'])
    bnrdw = _bn_pack(params['right_dw_bn'])
    bn2 = _bn_pack(params['right_pw2_bn'])

    def _stream(tail):                       # streamed per-(image,row-block) tile
        nd = len(tail)
        return pl.BlockSpec((None, None) + tail, lambda i, j: (i, j) + (0,) * nd)

    def _resident(shape):                    # VMEM-resident across the whole grid
        nd = len(shape)
        return pl.BlockSpec(shape, lambda i, j: (0,) * nd)

    kernel = functools.partial(_down_block_kernel, wp, we, wo, toh, cin, mid)

    act_bytes = jnp.dtype(act_dtype).itemsize
    m_slab = n * ho * 3 * wp
    m_out = n * ho * wo
    flops = int(2 * m_slab * cin * mid            # right pw1 on the slab
                + 18 * m_out * (cin + mid)        # both depthwise convs
                + 2 * m_out * cin * mid           # left 1x1
                + 2 * m_out * mid * mid)          # right pw2
    bytes_accessed = int((xs.size + ms.size) * act_bytes
                         + m_out * cout * 4
                         + (dwl.size + dwr.size + 10 * max(cin, mid)) * 4
                         + (w1.size + wl.size + w2.size) * act_bytes)
    vmem_need = (2 * (r_rows * cin + r_rows) * act_bytes      # double-buffered inputs
                 + 2 * toh * wo * cout * 4                    # double-buffered output
                 + (r_rows * mid + toh * wo * (cin + mid)) * 4)   # scratch
    vmem_limit = int(min(max(6 * vmem_need, 32 * 1024 * 1024), 48 * 1024 * 1024))

    out = pl.pallas_call(
        kernel,
        out_shape=jax.ShapeDtypeStruct((n, nhb, toh * wo, cout), jnp.float32),
        grid=(n, nhb),
        in_specs=[
            _stream((r_rows, cin)),          # activation row slab
            _stream((r_rows, 1)),            # padding-validity mask
            _resident((9, cin)),             # left depthwise weights
            _resident((2, cin)),             # left depthwise BN
            _resident((cin, mid)),           # left 1x1 weights
            _resident((2, mid)),             # left 1x1 BN
            _resident((cin, mid)),           # right pw1 weights
            _resident((2, mid)),             # right pw1 BN
            _resident((9, mid)),             # right depthwise weights
            _resident((2, mid)),             # right depthwise BN
            _resident((mid, mid)),           # right pw2 weights
            _resident((2, mid)),             # right pw2 BN
        ],
        out_specs=_stream((toh * wo, cout)),
        scratch_shapes=[
            pltpu.VMEM((r_rows, mid), jnp.float32),        # masked pw1 output
            pltpu.VMEM((toh * wo, cin), jnp.float32),      # left dw accumulator
            pltpu.VMEM((toh * wo, mid), jnp.float32),      # right dw accumulator
        ],
        compiler_params=pltpu.CompilerParams(
            dimension_semantics=("parallel", "parallel"),
            vmem_limit_bytes=vmem_limit),
        cost_estimate=pl.CostEstimate(
            flops=flops, transcendentals=0, bytes_accessed=bytes_accessed),
    )(xs, ms, dwl, bnldw, wl, bnlpw, w1, bn1, dwr, bnrdw, w2, bn2)

    out = out.reshape(n, ho, wo, cout)                 # un-tile rows (concat order)
    out = channel_shuffle_nhwc(out, groups)            # static channel permutation
    return jnp.transpose(out, (0, 3, 1, 2))            # back to NCHW (one XLA copy)


# ---------------------- pure-JAX reference (for checking) --------------------

def _ref_dw(x_nhwc, w9c):
    c = x_nhwc.shape[-1]
    return jax.lax.conv_general_dilated(
        x_nhwc, w9c.reshape(3, 3, 1, c), window_strides=(2, 2),
        padding=((1, 1), (1, 1)), dimension_numbers=('NHWC', 'HWIO', 'NHWC'),
        feature_group_count=c, precision=jax.lax.Precision.HIGHEST)


def reference(x_nchw, params, groups=2, act_dtype=jnp.bfloat16):
    # Mirrors the kernel's bf16 rounding of activations / 1x1 weights; all
    # arithmetic in f32 (HIGHEST precision) like the kernel's f32 accumulation.
    x = jnp.transpose(x_nchw, (0, 2, 3, 1)).astype(act_dtype).astype(jnp.float32)
    wl = params['left_pw_w'].astype(act_dtype).astype(jnp.float32)
    w1 = params['right_pw1_w'].astype(act_dtype).astype(jnp.float32)
    w2 = params['right_pw2_w'].astype(act_dtype).astype(jnp.float32)

    def pw(t, ww, bn):
        s, b = bn_fold(*bn)
        z = jnp.einsum('nhwc,cd->nhwd', t, ww, precision=jax.lax.Precision.HIGHEST)
        return jnp.maximum(z * s + b, 0.0)

    s, b = bn_fold(*params['left_dw_bn'])
    l = _ref_dw(x, params['left_dw_w']) * s + b
    l = pw(l, wl, params['left_pw_bn'])

    r = pw(x, w1, params['right_pw1_bn'])
    s, b = bn_fold(*params['right_dw_bn'])
    r = _ref_dw(r, params['right_dw_w']) * s + b
    r = pw(r, w2, params['right_pw2_bn'])

    cat = jnp.concatenate([l, r], axis=-1)
    return jnp.transpose(channel_shuffle_nhwc(cat, groups), (0, 3, 1, 2))


# -------------------------------- param init ---------------------------------

def make_params(key, in_channels, out_channels):
    mid = out_channels // 2
    ks = jax.random.split(key, 12)

    def nrm(k, shape, scale=0.5):
        return scale * jax.random.normal(k, shape, jnp.float32)

    def bn(k, c):
        k1, k2, k3, k4 = jax.random.split(k, 4)
        gamma = 1.0 + 0.1 * jax.random.normal(k1, (c,), jnp.float32)
        beta = 0.1 * jax.random.normal(k2, (c,), jnp.float32)
        mean = 0.1 * jax.random.normal(k3, (c,), jnp.float32)
        var = jnp.abs(jax.random.normal(k4, (c,), jnp.float32)) + 0.5
        return (gamma, beta, mean, var)

    return {
        # left: depthwise 3x3 (as (9, C)), its BN, 1x1 conv (Cin, mid), its BN
        'left_dw_w': nrm(ks[0], (9, in_channels)),
        'left_dw_bn': bn(ks[1], in_channels),
        'left_pw_w': nrm(ks[2], (in_channels, mid)),
        'left_pw_bn': bn(ks[3], mid),
        # right: 1x1 (Cin, mid)+BN, depthwise 3x3 (9, mid)+BN, 1x1 (mid, mid)+BN
        'right_pw1_w': nrm(ks[4], (in_channels, mid)),
        'right_pw1_bn': bn(ks[5], mid),
        'right_dw_w': nrm(ks[6], (9, mid)),
        'right_dw_bn': bn(ks[7], mid),
        'right_pw2_w': nrm(ks[8], (mid, mid)),
        'right_pw2_bn': bn(ks[9], mid),
    }


# ----------------------------------- main -------------------------------------

if __name__ == "__main__":
    key = jax.random.PRNGKey(0)
    k_x, k_p = jax.random.split(key)

    N, Cin, H, W = 2, 4, 16, 16
    Cout = 8                               # mid = 4
    x = jax.random.normal(k_x, (N, Cin, H, W), jnp.float32)   # NCHW like PyTorch
    params = make_params(k_p, Cin, Cout)

    # TODO(synk): BatchNorm is reproduced in inference mode (folded running
    # stats); PyTorch train-mode batch statistics are not modeled.
    fwd = jax.jit(functools.partial(down_block_forward, groups=2, block_rows=4))
    out = jax.block_until_ready(fwd(x, params))

    ref = jax.block_until_ready(reference(x, params, groups=2))
    assert out.shape == (N, Cout, H // 2, W // 2), out.shape
    err = float(jnp.max(jnp.abs(out - ref)))
    # Tolerance covers MXU matmul pass decomposition; bf16 operand rounding is
    # mirrored in the reference so real bugs show up as O(1) errors.
    assert jnp.allclose(out, ref, atol=5e-2, rtol=5e-2), err

    print("KERNEL_OK")
</pallas_src>

<mosaic_0001>
module attributes {stable_mosaic.version = 11 : i64} {
  func.func @_down_block_kernel(%arg0: i32, %arg1: i32, %arg2: memref<1x1x216x4xbf16, #tpu.memory_space<vmem>>, %arg3: memref<1x1x216x1xbf16, #tpu.memory_space<vmem>>, %arg4: memref<9x4xf32, #tpu.memory_space<vmem>>, %arg5: memref<2x4xf32, #tpu.memory_space<vmem>>, %arg6: memref<4x4xbf16, #tpu.memory_space<vmem>>, %arg7: memref<2x4xf32, #tpu.memory_space<vmem>>, %arg8: memref<4x4xbf16, #tpu.memory_space<vmem>>, %arg9: memref<2x4xf32, #tpu.memory_space<vmem>>, %arg10: memref<9x4xf32, #tpu.memory_space<vmem>>, %arg11: memref<2x4xf32, #tpu.memory_space<vmem>>, %arg12: memref<4x4xbf16, #tpu.memory_space<vmem>>, %arg13: memref<2x4xf32, #tpu.memory_space<vmem>>, %arg14: memref<1x1x32x8xf32, #tpu.memory_space<vmem>>, %arg15: memref<216x4xf32, #tpu.memory_space<vmem>>, %arg16: memref<32x4xf32, #tpu.memory_space<vmem>>, %arg17: memref<32x4xf32, #tpu.memory_space<vmem>>) attributes {dimension_semantics = [#tpu.dimension_semantics<parallel>, #tpu.dimension_semantics<parallel>], iteration_bounds = array<i64: 2, 2>, scalar_prefetch = 0 : i64, scratch_operands = 3 : i64, tpu.core_type = #tpu.core_type<tc>, window_params = [{transform_indices = @transform_0, window_bounds = array<i64: 1, 1, 216, 4>}, {transform_indices = @transform_1, window_bounds = array<i64: 1, 1, 216, 1>}, {pipeline_mode = #tpu.pipeline_mode<synchronous>, transform_indices = @transform_2, window_bounds = array<i64: 9, 4>}, {pipeline_mode = #tpu.pipeline_mode<synchronous>, transform_indices = @transform_3, window_bounds = array<i64: 2, 4>}, {pipeline_mode = #tpu.pipeline_mode<synchronous>, transform_indices = @transform_4, window_bounds = array<i64: 4, 4>}, {pipeline_mode = #tpu.pipeline_mode<synchronous>, transform_indices = @transform_5, window_bounds = array<i64: 2, 4>}, {pipeline_mode = #tpu.pipeline_mode<synchronous>, transform_indices = @transform_6, window_bounds = array<i64: 4, 4>}, {pipeline_mode = #tpu.pipeline_mode<synchronous>, transform_indices = @transform_7, window_bounds = array<i64: 2, 4>}, {pipeline_mode = #tpu.pipeline_mode<synchronous>, transform_indices = @transform_8, window_bounds = array<i64: 9, 4>}, {pipeline_mode = #tpu.pipeline_mode<synchronous>, transform_indices = @transform_9, window_bounds = array<i64: 2, 4>}, {pipeline_mode = #tpu.pipeline_mode<synchronous>, transform_indices = @transform_10, window_bounds = array<i64: 4, 4>}, {pipeline_mode = #tpu.pipeline_mode<synchronous>, transform_indices = @transform_11, window_bounds = array<i64: 2, 4>}, {transform_indices = @transform_12, window_bounds = array<i64: 1, 1, 32, 8>}]} {
    %c0 = arith.constant 0 : index
    %c0_0 = arith.constant 0 : index
    %c0_1 = arith.constant 0 : index
    %c0_2 = arith.constant 0 : index
    %0 = vector.load %arg2[%c0, %c0_0, %c0_1, %c0_2] : memref<1x1x216x4xbf16, #tpu.memory_space<vmem>>, vector<1x1x216x4xbf16>
    %1 = vector.shape_cast %0 : vector<1x1x216x4xbf16> to vector<216x4xbf16>
    %c0_3 = arith.constant 0 : index
    %c0_4 = arith.constant 0 : index
    %2 = vector.load %arg8[%c0_3, %c0_4] : memref<4x4xbf16, #tpu.memory_space<vmem>>, vector<4x4xbf16>
    %cst = arith.constant dense<0.000000e+00> : vector<216x4xf32>
    %3 = tpu.matmul %1, %2, %cst {dimension_numbers = #tpu.dot_dimension_numbers<[1], [0], [0], [1], [0, 0, 1, 1], [], []>} : vector<216x4xbf16>, vector<4x4xbf16>, vector<216x4xf32> -> vector<216x4xf32>
    %c0_5 = arith.constant 0 : index
    %c0_6 = arith.constant 0 : index
    %4 = vector.load %arg9[%c0_5, %c0_6] : memref<2x4xf32, #tpu.memory_space<vmem>>, vector<1x4xf32>
    %5 = vector.broadcast %4 : vector<1x4xf32> to vector<216x4xf32>
    %6 = arith.mulf %3, %5 : vector<216x4xf32>
    %c1 = arith.constant 1 : index
    %c0_7 = arith.constant 0 : index
    %7 = vector.load %arg9[%c1, %c0_7] : memref<2x4xf32, #tpu.memory_space<vmem>>, vector<1x4xf32>
    %8 = vector.broadcast %7 : vector<1x4xf32> to vector<216x4xf32>
    %9 = arith.addf %6, %8 : vector<216x4xf32>
    %cst_8 = arith.constant 0.000000e+00 : f32
    %10 = vector.broadcast %cst_8 : f32 to vector<216x4xf32>
    %11 = arith.maximumf %9, %10 : vector<216x4xf32>
    %c0_9 = arith.constant 0 : index
    %c0_10 = arith.constant 0 : index
    %c0_11 = arith.constant 0 : index
    %c0_12 = arith.constant 0 : index
    %12 = vector.load %arg3[%c0_9, %c0_10, %c0_11, %c0_12] : memref<1x1x216x1xbf16, #tpu.memory_space<vmem>>, vector<1x1x216x1xbf16>
    %13 = vector.shape_cast %12 : vector<1x1x216x1xbf16> to vector<216x1xbf16>
    %14 = arith.extf %13 : vector<216x1xbf16> to vector<216x1xf32>
    %15 = vector.broadcast %14 : vector<216x1xf32> to vector<216x4xf32>
    %16 = arith.mulf %11, %15 : vector<216x4xf32>
    %c0_13 = arith.constant 0 : index
    %c0_14 = arith.constant 0 : index
    %17 = vector.load %arg15[%c0_13, %c0_14] : memref<216x4xf32, #tpu.memory_space<vmem>>, vector<216x4xf32>
    tpu.vector_store %arg15[%c0_13, %c0_14], %16 {strides = array<i32>} : memref<216x4xf32, #tpu.memory_space<vmem>>, vector<216x4xf32>,
    %c0_15 = arith.constant 0 : index
    %c0_16 = arith.constant 0 : index
    %18 = vector.load %arg4[%c0_15, %c0_16] : memref<9x4xf32, #tpu.memory_space<vmem>>, vector<9x4xf32>
    %c0_17 = arith.constant 0 : index
    %c0_18 = arith.constant 0 : index
    %19 = vector.load %arg10[%c0_17, %c0_18] : memref<9x4xf32, #tpu.memory_space<vmem>>, vector<9x4xf32>
    %cst_19 = arith.constant 0.000000e+00 : f32
    %20 = vector.broadcast %cst_19 : f32 to vector<8x4xf32>
    %cst_20 = arith.constant 0.000000e+00 : f32
    %21 = vector.broadcast %cst_20 : f32 to vector<8x4xf32>
    %c0_21 = arith.constant 0 : index
    %c0_22 = arith.constant 0 : index
    %c0_23 = arith.constant 0 : index
    %c0_24 = arith.constant 0 : index
    %22 = vector.load %arg2[%c0_21, %c0_22, %c0_23, %c0_24] : memref<1x1x216x4xbf16, #tpu.memory_space<vmem>>, vector<1x1x8x4xbf16>
    %23 = vector.shape_cast %22 : vector<1x1x8x4xbf16> to vector<8x4xbf16>
    %24 = arith.extf %23 : vector<8x4xbf16> to vector<8x4xf32>
    %25 = vector.extract_strided_slice %18 {offsets = [0, 0], sizes = [1, 4], strides = [1, 1]} : vector<9x4xf32> to vector<1x4xf32>
    %26 = vector.broadcast %25 : vector<1x4xf32> to vector<8x4xf32>
    %27 = arith.mulf %24, %26 : vector<8x4xf32>
    %28 = arith.addf %20, %27 : vector<8x4xf32>
    %c0_25 = arith.constant 0 : index
    %c0_26 = arith.constant 0 : index
    %29 = vector.load %arg15[%c0_25, %c0_26] : memref<216x4xf32, #tpu.memory_space<vmem>>, vector<8x4xf32>
    %30 = vector.extract_strided_slice %19 {offsets = [0, 0], sizes = [1, 4], strides = [1, 1]} : vector<9x4xf32> to vector<1x4xf32>
    %31 = vector.broadcast %30 : vector<1x4xf32> to vector<8x4xf32>
    %32 = arith.mulf %29, %31 : vector<8x4xf32>
    %33 = arith.addf %21, %32 : vector<8x4xf32>
    %c0_27 = arith.constant 0 : index
    %c0_28 = arith.constant 0 : index
    %c9 = arith.constant 9 : index
    %c0_29 = arith.constant 0 : index
    %34 = vector.load %arg2[%c0_27, %c0_28, %c9, %c0_29] : memref<1x1x216x4xbf16, #tpu.memory_space<vmem>>, vector<1x1x8x4xbf16>
    %35 = vector.shape_cast %34 : vector<1x1x8x4xbf16> to vector<8x4xbf16>
    %36 = arith.extf %35 : vector<8x4xbf16> to vector<8x4xf32>
    %37 = vector.extract_strided_slice %18 {offsets = [1, 0], sizes = [1, 4], strides = [1, 1]} : vector<9x4xf32> to vector<1x4xf32>
    %38 = vector.broadcast %37 : vector<1x4xf32> to vector<8x4xf32>
    %39 = arith.mulf %36, %38 : vector<8x4xf32>
    %40 = arith.addf %28, %39 : vector<8x4xf32>
    %c9_30 = arith.constant 9 : index
    %c0_31 = arith.constant 0 : index
    %41 = vector.load %arg15[%c9_30, %c0_31] : memref<216x4xf32, #tpu.memory_space<vmem>>, vector<8x4xf32>
    %42 = vector.extract_strided_slice %19 {offsets = [1, 0], sizes = [1, 4], strides = [1, 1]} : vector<9x4xf32> to vector<1x4xf32>
    %43 = vector.broadcast %42 : vector<1x4xf32> to vector<8x4xf32>
    %44 = arith.mulf %41, %43 : vector<8x4xf32>
    %45 = arith.addf %33, %44 : vector<8x4xf32>
    %c0_32 = arith.constant 0 : index
    %c0_33 = arith.constant 0 : index
    %c1_34 = arith.constant 1 : index
    %c0_35 = arith.constant 0 : index
    %46 = vector.load %arg2[%c0_32, %c0_33, %c1_34, %c0_35] : memref<1x1x216x4xbf16, #tpu.memory_space<vmem>>, vector<1x1x8x4xbf16>
    %47 = vector.shape_cast %46 : vector<1x1x8x4xbf16> to vector<8x4xbf16>
    %48 = arith.extf %47 : vector<8x4xbf16> to vector<8x4xf32>
    %49 = vector.extract_strided_slice %18 {offsets = [2, 0], sizes = [1, 4], strides = [1, 1]} : vector<9x4xf32> to vector<1x4xf32>
    %50 = vector.broadcast %49 : vector<1x4xf32> to vector<8x4xf32>
    %51 = arith.mulf %48, %50 : vector<8x4xf32>
    %52 = arith.addf %40, %51 : vector<8x4xf32>
    %c1_36 = arith.constant 1 : index
    %c0_37 = arith.constant 0 : index
    %53 = vector.load %arg15[%c1_36, %c0_37] : memref<216x4xf32, #tpu.memory_space<vmem>>, vector<8x4xf32>
    %54 = vector.extract_strided_slice %19 {offsets = [2, 0], sizes = [1, 4], strides = [1, 1]} : vector<9x4xf32> to vector<1x4xf32>
    %55 = vector.broadcast %54 : vector<1x4xf32> to vector<8x4xf32>
    %56 = arith.mulf %53, %55 : vector<8x4xf32>
    %57 = arith.addf %45, %56 : vector<8x4xf32>
    %c0_38 = arith.constant 0 : index
    %c0_39 = arith.constant 0 : index
    %c18 = arith.constant 18 : index
    %c0_40 = arith.constant 0 : index
    %58 = vector.load %arg2[%c0_38, %c0_39, %c18, %c0_40] : memref<1x1x216x4xbf16, #tpu.memory_space<vmem>>, vector<1x1x8x4xbf16>
    %59 = vector.shape_cast %58 : vector<1x1x8x4xbf16> to vector<8x4xbf16>
    %60 = arith.extf %59 : vector<8x4xbf16> to vector<8x4xf32>
    %61 = vector.extract_strided_slice %18 {offsets = [3, 0], sizes = [1, 4], strides = [1, 1]} : vector<9x4xf32> to vector<1x4xf32>
    %62 = vector.broadcast %61 : vector<1x4xf32> to vector<8x4xf32>
    %63 = arith.mulf %60, %62 : vector<8x4xf32>
    %64 = arith.addf %52, %63 : vector<8x4xf32>
    %c18_41 = arith.constant 18 : index
    %c0_42 = arith.constant 0 : index
    %65 = vector.load %arg15[%c18_41, %c0_42] : memref<216x4xf32, #tpu.memory_space<vmem>>, vector<8x4xf32>
    %66 = vector.extract_strided_slice %19 {offsets = [3, 0], sizes = [1, 4], strides = [1, 1]} : vector<9x4xf32> to vector<1x4xf32>
    %67 = vector.broadcast %66 : vector<1x4xf32> to vector<8x4xf32>
    %68 = arith.mulf %65, %67 : vector<8x4xf32>
    %69 = arith.addf %57, %68 : vector<8x4xf32>
    %c0_43 = arith.constant 0 : index
    %c0_44 = arith.constant 0 : index
    %c27 = arith.constant 27 : index
    %c0_45 = arith.constant 0 : index
    %70 = vector.load %arg2[%c0_43, %c0_44, %c27, %c0_45] : memref<1x1x216x4xbf16, #tpu.memory_space<vmem>>, vector<1x1x8x4xbf16>
    %71 = vector.shape_cast %70 : vector<1x1x8x4xbf16> to vector<8x4xbf16>
    %72 = arith.extf %71 : vector<8x4xbf16> to vector<8x4xf32>
    %73 = vector.extract_strided_slice %18 {offsets = [4, 0], sizes = [1, 4], strides = [1, 1]} : vector<9x4xf32> to vector<1x4xf32>
    %74 = vector.broadcast %73 : vector<1x4xf32> to vector<8x4xf32>
    %75 = arith.mulf %72, %74 : vector<8x4xf32>
    %76 = arith.addf %64, %75 : vector<8x4xf32>
    %c27_46 = arith.constant 27 : index
    %c0_47 = arith.constant 0 : index
    %77 = vector.load %arg15[%c27_46, %c0_47] : memref<216x4xf32, #tpu.memory_space<vmem>>, vector<8x4xf32>
    %78 = vector.extract_strided_slice %19 {offsets = [4, 0], sizes = [1, 4], strides = [1, 1]} : vector<9x4xf32> to vector<1x4xf32>
    %79 = vector.broadcast %78 : vector<1x4xf32> to vector<8x4xf32>
    %80 = arith.mulf %77, %79 : vector<8x4xf32>
    %81 = arith.addf %69, %80 : vector<8x4xf32>
    %c0_48 = arith.constant 0 : index
    %c0_49 = arith.constant 0 : index
    %c19 = arith.constant 19 : index
    %c0_50 = arith.constant 0 : index
    %82 = vector.load %arg2[%c0_48, %c0_49, %c19, %c0_50] : memref<1x1x216x4xbf16, #tpu.memory_space<vmem>>, vector<1x1x8x4xbf16>
    %83 = vector.shape_cast %82 : vector<1x1x8x4xbf16> to vector<8x4xbf16>
    %84 = arith.extf %83 : vector<8x4xbf16> to vector<8x4xf32>
    %85 = vector.extract_strided_slice %18 {offsets = [5, 0], sizes = [1, 4], strides = [1, 1]} : vector<9x4xf32> to vector<1x4xf32>
    %86 = vector.broadcast %85 : vector<1x4xf32> to vector<8x4xf32>
    %87 = arith.mulf %84, %86 : vector<8x4xf32>
    %88 = arith.addf %76, %87 : vector<8x4xf32>
    %c19_51 = arith.constant 19 : index
    %c0_52 = arith.constant 0 : index
    %89 = vector.load %arg15[%c19_51, %c0_52] : memref<216x4xf32, #tpu.memory_space<vmem>>, vector<8x4xf32>
    %90 = vector.extract_strided_slice %19 {offsets = [5, 0], sizes = [1, 4], strides = [1, 1]} : vector<9x4xf32> to vector<1x4xf32>
    %91 = vector.broadcast %90 : vector<1x4xf32> to vector<8x4xf32>
    %92 = arith.mulf %89, %91 : vector<8x4xf32>
    %93 = arith.addf %81, %92 : vector<8x4xf32>
    %c0_53 = arith.constant 0 : index
    %c0_54 = arith.constant 0 : index
    %c36 = arith.constant 36 : index
    %c0_55 = arith.constant 0 : index
    %94 = vector.load %arg2[%c0_53, %c0_54, %c36, %c0_55] : memref<1x1x216x4xbf16, #tpu.memory_space<vmem>>, vector<1x1x8x4xbf16>
    %95 = vector.shape_cast %94 : vector<1x1x8x4xbf16> to vector<8x4xbf16>
    %96 = arith.extf %95 : vector<8x4xbf16> to vector<8x4xf32>
    %97 = vector.extract_strided_slice %18 {offsets = [6, 0], sizes = [1, 4], strides = [1, 1]} : vector<9x4xf32> to vector<1x4xf32>
    %98 = vector.broadcast %97 : vector<1x4xf32> to vector<8x4xf32>
    %99 = arith.mulf %96, %98 : vector<8x4xf32>
    %100 = arith.addf %88, %99 : vector<8x4xf32>
    %c36_56 = arith.constant 36 : index
    %c0_57 = arith.constant 0 : index
    %101 = vector.load %arg15[%c36_56, %c0_57] : memref<216x4xf32, #tpu.memory_space<vmem>>, vector<8x4xf32>
    %102 = vector.extract_strided_slice %19 {offsets = [6, 0], sizes = [1, 4], strides = [1, 1]} : vector<9x4xf32> to vector<1x4xf32>
    %103 = vector.broadcast %102 : vector<1x4xf32> to vector<8x4xf32>
    %104 = arith.mulf %101, %103 : vector<8x4xf32>
    %105 = arith.addf %93, %104 : vector<8x4xf32>
    %c0_58 = arith.constant 0 : index
    %c0_59 = arith.constant 0 : index
    %c45 = arith.constant 45 : index
    %c0_60 = arith.constant 0 : index
    %106 = vector.load %arg2[%c0_58, %c0_59, %c45, %c0_60] : memref<1x1x216x4xbf16, #tpu.memory_space<vmem>>, vector<1x1x8x4xbf16>
    %107 = vector.shape_cast %106 : vector<1x1x8x4xbf16> to vector<8x4xbf16>
    %108 = arith.extf %107 : vector<8x4xbf16> to vector<8x4xf32>
    %109 = vector.extract_strided_slice %18 {offsets = [7, 0], sizes = [1, 4], strides = [1, 1]} : vector<9x4xf32> to vector<1x4xf32>
    %110 = vector.broadcast %109 : vector<1x4xf32> to vector<8x4xf32>
    %111 = arith.mulf %108, %110 : vector<8x4xf32>
    %112 = arith.addf %100, %111 : vector<8x4xf32>
    %c45_61 = arith.constant 45 : index
    %c0_62 = arith.constant 0 : index
    %113 = vector.load %arg15[%c45_61, %c0_62] : memref<216x4xf32, #tpu.memory_space<vmem>>, vector<8x4xf32>
    %114 = vector.extract_strided_slice %19 {offsets = [7, 0], sizes = [1, 4], strides = [1, 1]} : vector<9x4xf32> to vector<1x4xf32>
    %115 = vector.broadcast %114 : vector<1x4xf32> to vector<8x4xf32>
    %116 = arith.mulf %113, %115 : vector<8x4xf32>
    %117 = arith.addf %105, %116 : vector<8x4xf32>
    %c0_63 = arith.constant 0 : index
    %c0_64 = arith.constant 0 : index
    %c37 = arith.constant 37 : index
    %c0_65 = arith.constant 0 : index
    %118 = vector.load %arg2[%c0_63, %c0_64, %c37, %c0_65] : memref<1x1x216x4xbf16, #tpu.memory_space<vmem>>, vector<1x1x8x4xbf16>
    %119 = vector.shape_cast %118 : vector<1x1x8x4xbf16> to vector<8x4xbf16>
    %120 = arith.extf %119 : vector<8x4xbf16> to vector<8x4xf32>
    %121 = vector.extract_strided_slice %18 {offsets = [8, 0], sizes = [1, 4], strides = [1, 1]} : vector<9x4xf32> to vector<1x4xf32>
    %122 = vector.broadcast %121 : vector<1x4xf32> to vector<8x4xf32>
    %123 = arith.mulf %120, %122 : vector<8x4xf32>
    %124 = arith.addf %112, %123 : vector<8x4xf32>
    %c37_66 = arith.constant 37 : index
    %c0_67 = arith.constant 0 : index
    %125 = vector.load %arg15[%c37_66, %c0_67] : memref<216x4xf32, #tpu.memory_space<vmem>>, vector<8x4xf32>
    %126 = vector.extract_strided_slice %19 {offsets = [8, 0], sizes = [1, 4], strides = [1, 1]} : vector<9x4xf32> to vector<1x4xf32>
    %127 = vector.broadcast %126 : vector<1x4xf32> to vector<8x4xf32>
    %128 = arith.mulf %125, %127 : vector<8x4xf32>
    %129 = arith.addf %117, %128 : vector<8x4xf32>
    %c0_68 = arith.constant 0 : index
    %c0_69 = arith.constant 0 : index
    %130 = vector.load %arg16[%c0_68, %c0_69] : memref<32x4xf32, #tpu.memory_space<vmem>>, vector<8x4xf32>
    tpu.vector_store %arg16[%c0_68, %c0_69], %124 {strides = array<i32>} : memref<32x4xf32, #tpu.memory_space<vmem>>, vector<8x4xf32>,
    %c0_70 = arith.constant 0 : index
    %c0_71 = arith.constant 0 : index
    %131 = vector.load %arg17[%c0_70, %c0_71] : memref<32x4xf32, #tpu.memory_space<vmem>>, vector<8x4xf32>
    tpu.vector_store %arg17[%c0_70, %c0_71], %129 {strides = array<i32>} : memref<32x4xf32, #tpu.memory_space<vmem>>, vector<8x4xf32>,
    %cst_72 = arith.constant 0.000000e+00 : f32
    %132 = vector.broadcast %cst_72 : f32 to vector<8x4xf32>
    %cst_73 = arith.constant 0.000000e+00 : f32
    %133 = vector.broadcast %cst_73 : f32 to vector<8x4xf32>
    %c0_74 = arith.constant 0 : index
    %c0_75 = arith.constant 0 : index
    %c54 = arith.constant 54 : index
    %c0_76 = arith.constant 0 : index
    %134 = vector.load %arg2[%c0_74, %c0_75, %c54, %c0_76] : memref<1x1x216x4xbf16, #tpu.memory_space<vmem>>, vector<1x1x8x4xbf16>
    %135 = vector.shape_cast %134 : vector<1x1x8x4xbf16> to vector<8x4xbf16>
    %136 = arith.extf %135 : vector<8x4xbf16> to vector<8x4xf32>
    %137 = vector.extract_strided_slice %18 {offsets = [0, 0], sizes = [1, 4], strides = [1, 1]} : vector<9x4xf32> to vector<1x4xf32>
    %138 = vector.broadcast %137 : vector<1x4xf32> to vector<8x4xf32>
    %139 = arith.mulf %136, %138 : vector<8x4xf32>
    %140 = arith.addf %132, %139 : vector<8x4xf32>
    %c54_77 = arith.constant 54 : index
    %c0_78 = arith.constant 0 : index
    %141 = vector.load %arg15[%c54_77, %c0_78] : memref<216x4xf32, #tpu.memory_space<vmem>>, vector<8x4xf32>
    %142 = vector.extract_strided_slice %19 {offsets = [0, 0], sizes = [1, 4], strides = [1, 1]} : vector<9x4xf32> to vector<1x4xf32>
    %143 = vector.broadcast %142 : vector<1x4xf32> to vector<8x4xf32>
    %144 = arith.mulf %141, %143 : vector<8x4xf32>
    %145 = arith.addf %133, %144 : vector<8x4xf32>
    %c0_79 = arith.constant 0 : index
    %c0_80 = arith.constant 0 : index
    %c63 = arith.constant 63 : index
    %c0_81 = arith.constant 0 : index
    %146 = vector.load %arg2[%c0_79, %c0_80, %c63, %c0_81] : memref<1x1x216x4xbf16, #tpu.memory_space<vmem>>, vector<1x1x8x4xbf16>
    %147 = vector.shape_cast %146 : vector<1x1x8x4xbf16> to vector<8x4xbf16>
    %148 = arith.extf %147 : vector<8x4xbf16> to vector<8x4xf32>
    %149 = vector.extract_strided_slice %18 {offsets = [1, 0], sizes = [1, 4], strides = [1, 1]} : vector<9x4xf32> to vector<1x4xf32>
    %150 = vector.broadcast %149 : vector<1x4xf32> to vector<8x4xf32>
    %151 = arith.mulf %148, %150 : vector<8x4xf32>
    %152 = arith.addf %140, %151 : vector<8x4xf32>
    %c63_82 = arith.constant 63 : index
    %c0_83 = arith.constant 0 : index
    %153 = vector.load %arg15[%c63_82, %c0_83] : memref<216x4xf32, #tpu.memory_space<vmem>>, vector<8x4xf32>
    %154 = vector.extract_strided_slice %19 {offsets = [1, 0], sizes = [1, 4], strides = [1, 1]} : vector<9x4xf32> to vector<1x4xf32>
    %155 = vector.broadcast %154 : vector<1x4xf32> to vector<8x4xf32>
    %156 = arith.mulf %153, %155 : vector<8x4xf32>
    %157 = arith.addf %145, %156 : vector<8x4xf32>
    %c0_84 = arith.constant 0 : index
    %c0_85 = arith.constant 0 : index
    %c55 = arith.constant 55 : index
    %c0_86 = arith.constant 0 : index
    %158 = vector.load %arg2[%c0_84, %c0_85, %c55, %c0_86] : memref<1x1x216x4xbf16, #tpu.memory_space<vmem>>, vector<1x1x8x4xbf16>
    %159 = vector.shape_cast %158 : vector<1x1x8x4xbf16> to vector<8x4xbf16>
    %160 = arith.extf %159 : vector<8x4xbf16> to vector<8x4xf32>
    %161 = vector.extract_strided_slice %18 {offsets = [2, 0], sizes = [1, 4], strides = [1, 1]} : vector<9x4xf32> to vector<1x4xf32>
    %162 = vector.broadcast %161 : vector<1x4xf32> to vector<8x4xf32>
    %163 = arith.mulf %160, %162 : vector<8x4xf32>
    %164 = arith.addf %152, %163 : vector<8x4xf32>
    %c55_87 = arith.constant 55 : index
    %c0_88 = arith.constant 0 : index
    %165 = vector.load %arg15[%c55_87, %c0_88] : memref<216x4xf32, #tpu.memory_space<vmem>>, vector<8x4xf32>
    %166 = vector.extract_strided_slice %19 {offsets = [2, 0], sizes = [1, 4], strides = [1, 1]} : vector<9x4xf32> to vector<1x4xf32>
    %167 = vector.broadcast %166 : vector<1x4xf32> to vector<8x4xf32>
    %168 = arith.mulf %165, %167 : vector<8x4xf32>
    %169 = arith.addf %157, %168 : vector<8x4xf32>
    %c0_89 = arith.constant 0 : index
    %c0_90 = arith.constant 0 : index
    %c72 = arith.constant 72 : index
    %c0_91 = arith.constant 0 : index
    %170 = vector.load %arg2[%c0_89, %c0_90, %c72, %c0_91] : memref<1x1x216x4xbf16, #tpu.memory_space<vmem>>, vector<1x1x8x4xbf16>
    %171 = vector.shape_cast %170 : vector<1x1x8x4xbf16> to vector<8x4xbf16>
    %172 = arith.extf %171 : vector<8x4xbf16> to vector<8x4xf32>
    %173 = vector.extract_strided_slice %18 {offsets = [3, 0], sizes = [1, 4], strides = [1, 1]} : vector<9x4xf32> to vector<1x4xf32>
    %174 = vector.broadcast %173 : vector<1x4xf32> to vector<8x4xf32>
    %175 = arith.mulf %172, %174 : vector<8x4xf32>
    %176 = arith.addf %164, %175 : vector<8x4xf32>
    %c72_92 = arith.constant 72 : index
    %c0_93 = arith.constant 0 : index
    %177 = vector.load %arg15[%c72_92, %c0_93] : memref<216x4xf32, #tpu.memory_space<vmem>>, vector<8x4xf32>
    %178 = vector.extract_strided_slice %19 {offsets = [3, 0], sizes = [1, 4], strides = [1, 1]} : vector<9x4xf32> to vector<1x4xf32>
    %179 = vector.broadcast %178 : vector<1x4xf32> to vector<8x4xf32>
    %180 = arith.mulf %177, %179 : vector<8x4xf32>
    %181 = arith.addf %169, %180 : vector<8x4xf32>
    %c0_94 = arith.constant 0 : index
    %c0_95 = arith.constant 0 : index
    %c81 = arith.constant 81 : index
    %c0_96 = arith.constant 0 : index
    %182 = vector.load %arg2[%c0_94, %c0_95, %c81, %c0_96] : memref<1x1x216x4xbf16, #tpu.memory_space<vmem>>, vector<1x1x8x4xbf16>
    %183 = vector.shape_cast %182 : vector<1x1x8x4xbf16> to vector<8x4xbf16>
    %184 = arith.extf %183 : vector<8x4xbf16> to vector<8x4xf32>
    %185 = vector.extract_strided_slice %18 {offsets = [4, 0], sizes = [1, 4], strides = [1, 1]} : vector<9x4xf32> to vector<1x4xf32>
    %186 = vector.broadcast %185 : vector<1x4xf32> to vector<8x4xf32>
    %187 = arith.mulf %184, %186 : vector<8x4xf32>
    %188 = arith.addf %176, %187 : vector<8x4xf32>
    %c81_97 = arith.constant 81 : index
    %c0_98 = arith.constant 0 : index
    %189 = vector.load %arg15[%c81_97, %c0_98] : memref<216x4xf32, #tpu.memory_space<vmem>>, vector<8x4xf32>
    %190 = vector.extract_strided_slice %19 {offsets = [4, 0], sizes = [1, 4], strides = [1, 1]} : vector<9x4xf32> to vector<1x4xf32>
    %191 = vector.broadcast %190 : vector<1x4xf32> to vector<8x4xf32>
    %192 = arith.mulf %189, %191 : vector<8x4xf32>
    %193 = arith.addf %181, %192 : vector<8x4xf32>
    %c0_99 = arith.constant 0 : index
    %c0_100 = arith.constant 0 : index
    %c73 = arith.constant 73 : index
    %c0_101 = arith.constant 0 : index
    %194 = vector.load %arg2[%c0_99, %c0_100, %c73, %c0_101] : memref<1x1x216x4xbf16, #tpu.memory_space<vmem>>, vector<1x1x8x4xbf16>
    %195 = vector.shape_cast %194 : vector<1x1x8x4xbf16> to vector<8x4xbf16>
    %196 = arith.extf %195 : vector<8x4xbf16> to vector<8x4xf32>
    %197 = vector.extract_strided_slice %18 {offsets = [5, 0], sizes = [1, 4], strides = [1, 1]} : vector<9x4xf32> to vector<1x4xf32>
    %198 = vector.broadcast %197 : vector<1x4xf32> to vector<8x4xf32>
    %199 = arith.mulf %196, %198 : vector<8x4xf32>
    %200 = arith.addf %188, %199 : vector<8x4xf32>
    %c73_102 = arith.constant 73 : index
    %c0_103 = arith.constant 0 : index
    %201 = vector.load %arg15[%c73_102, %c0_103] : memref<216x4xf32, #tpu.memory_space<vmem>>, vector<8x4xf32>
    %202 = vector.extract_strided_slice %19 {offsets = [5, 0], sizes = [1, 4], strides = [1, 1]} : vector<9x4xf32> to vector<1x4xf32>
    %203 = vector.broadcast %202 : vector<1x4xf32> to vector<8x4xf32>
    %204 = arith.mulf %201, %203 : vector<8x4xf32>
    %205 = arith.addf %193, %204 : vector<8x4xf32>
    %c0_104 = arith.constant 0 : index
    %c0_105 = arith.constant 0 : index
    %c90 = arith.constant 90 : index
    %c0_106 = arith.constant 0 : index
    %206 = vector.load %arg2[%c0_104, %c0_105, %c90, %c0_106] : memref<1x1x216x4xbf16, #tpu.memory_space<vmem>>, vector<1x1x8x4xbf16>
    %207 = vector.shape_cast %206 : vector<1x1x8x4xbf16> to vector<8x4xbf16>
    %208 = arith.extf %207 : vector<8x4xbf16> to vector<8x4xf32>
    %209 = vector.extract_strided_slice %18 {offsets = [6, 0], sizes = [1, 4], strides = [1, 1]} : vector<9x4xf32> to vector<1x4xf32>
    %210 = vector.broadcast %209 : vector<1x4xf32> to vector<8x4xf32>
    %211 = arith.mulf %208, %210 : vector<8x4xf32>
    %212 = arith.addf %200, %211 : vector<8x4xf32>
    %c90_107 = arith.constant 90 : index
    %c0_108 = arith.constant 0 : index
    %213 = vector.load %arg15[%c90_107, %c0_108] : memref<216x4xf32, #tpu.memory_space<vmem>>, vector<8x4xf32>
    %214 = vector.extract_strided_slice %19 {offsets = [6, 0], sizes = [1, 4], strides = [1, 1]} : vector<9x4xf32> to vector<1x4xf32>
    %215 = vector.broadcast %214 : vector<1x4xf32> to vector<8x4xf32>
    %216 = arith.mulf %213, %215 : vector<8x4xf32>
    %217 = arith.addf %205, %216 : vector<8x4xf32>
    %c0_109 = arith.constant 0 : index
    %c0_110 = arith.constant 0 : index
    %c99 = arith.constant 99 : index
    %c0_111 = arith.constant 0 : index
    %218 = vector.load %arg2[%c0_109, %c0_110, %c99, %c0_111] : memref<1x1x216x4xbf16, #tpu.memory_space<vmem>>, vector<1x1x8x4xbf16>
    %219 = vector.shape_cast %218 : vector<1x1x8x4xbf16> to vector<8x4xbf16>
    %220 = arith.extf %219 : vector<8x4xbf16> to vector<8x4xf32>
    %221 = vector.extract_strided_slice %18 {offsets = [7, 0], sizes = [1, 4], strides = [1, 1]} : vector<9x4xf32> to vector<1x4xf32>
    %222 = vector.broadcast %221 : vector<1x4xf32> to vector<8x4xf32>
    %223 = arith.mulf %220, %222 : vector<8x4xf32>
    %224 = arith.addf %212, %223 : vector<8x4xf32>
    %c99_112 = arith.constant 99 : index
    %c0_113 = arith.constant 0 : index
    %225 = vector.load %arg15[%c99_112, %c0_113] : memref<216x4xf32, #tpu.memory_space<vmem>>, vector<8x4xf32>
    %226 = vector.extract_strided_slice %19 {offsets = [7, 0], sizes = [1, 4], strides = [1, 1]} : vector<9x4xf32> to vector<1x4xf32>
    %227 = vector.broadcast %226 : vector<1x4xf32> to vector<8x4xf32>
    %228 = arith.mulf %225, %227 : vector<8x4xf32>
    %229 = arith.addf %217, %228 : vector<8x4xf32>
    %c0_114 = arith.constant 0 : index
    %c0_115 = arith.constant 0 : index
    %c91 = arith.constant 91 : index
    %c0_116 = arith.constant 0 : index
    %230 = vector.load %arg2[%c0_114, %c0_115, %c91, %c0_116] : memref<1x1x216x4xbf16, #tpu.memory_space<vmem>>, vector<1x1x8x4xbf16>
    %231 = vector.shape_cast %230 : vector<1x1x8x4xbf16> to vector<8x4xbf16>
    %232 = arith.extf %231 : vector<8x4xbf16> to vector<8x4xf32>
    %233 = vector.extract_strided_slice %18 {offsets = [8, 0], sizes = [1, 4], strides = [1, 1]} : vector<9x4xf32> to vector<1x4xf32>
    %234 = vector.broadcast %233 : vector<1x4xf32> to vector<8x4xf32>
    %235 = arith.mulf %232, %234 : vector<8x4xf32>
    %236 = arith.addf %224, %235 : vector<8x4xf32>
    %c91_117 = arith.constant 91 : index
    %c0_118 = arith.constant 0 : index
    %237 = vector.load %arg15[%c91_117, %c0_118] : memref<216x4xf32, #tpu.memory_space<vmem>>, vector<8x4xf32>
    %238 = vector.extract_strided_slice %19 {offsets = [8, 0], sizes = [1, 4], strides = [1, 1]} : vector<9x4xf32> to vector<1x4xf32>
    %239 = vector.broadcast %238 : vector<1x4xf32> to vector<8x4xf32>
    %240 = arith.mulf %237, %239 : vector<8x4xf32>
    %241 = arith.addf %229, %240 : vector<8x4xf32>
    %c8 = arith.constant 8 : index
    %c0_119 = arith.constant 0 : index
    %242 = vector.load %arg16[%c8, %c0_119] : memref<32x4xf32, #tpu.memory_space<vmem>>, vector<8x4xf32>
    tpu.vector_store %arg16[%c8, %c0_119], %236 {strides = array<i32>} : memref<32x4xf32, #tpu.memory_space<vmem>>, vector<8x4xf32>,
    %c8_120 = arith.constant 8 : index
    %c0_121 = arith.constant 0 : index
    %243 = vector.load %arg17[%c8_120, %c0_121] : memref<32x4xf32, #tpu.memory_space<vmem>>, vector<8x4xf32>
    tpu.vector_store %arg17[%c8_120, %c0_121], %241 {strides = array<i32>} : memref<32x4xf32, #tpu.memory_space<vmem>>, vector<8x4xf32>,
    %cst_122 = arith.constant 0.000000e+00 : f32
    %244 = vector.broadcast %cst_122 : f32 to vector<8x4xf32>
    %cst_123 = arith.constant 0.000000e+00 : f32
    %245 = vector.broadcast %cst_123 : f32 to vector<8x4xf32>
    %c0_124 = arith.constant 0 : index
    %c0_125 = arith.constant 0 : index
    %c108 = arith.constant 108 : index
    %c0_126 = arith.constant 0 : index
    %246 = vector.load %arg2[%c0_124, %c0_125, %c108, %c0_126] : memref<1x1x216x4xbf16, #tpu.memory_space<vmem>>, vector<1x1x8x4xbf16>
    %247 = vector.shape_cast %246 : vector<1x1x8x4xbf16> to vector<8x4xbf16>
    %248 = arith.extf %247 : vector<8x4xbf16> to vector<8x4xf32>
    %249 = vector.extract_strided_slice %18 {offsets = [0, 0], sizes = [1, 4], strides = [1, 1]} : vector<9x4xf32> to vector<1x4xf32>
    %250 = vector.broadcast %249 : vector<1x4xf32> to vector<8x4xf32>
    %251 = arith.mulf %248, %250 : vector<8x4xf32>
    %252 = arith.addf %244, %251 : vector<8x4xf32>
    %c108_127 = arith.constant 108 : index
    %c0_128 = arith.constant 0 : index
    %253 = vector.load %arg15[%c108_127, %c0_128] : memref<216x4xf32, #tpu.memory_space<vmem>>, vector<8x4xf32>
    %254 = vector.extract_strided_slice %19 {offsets = [0, 0], sizes = [1, 4], strides = [1, 1]} : vector<9x4xf32> to vector<1x4xf32>
    %255 = vector.broadcast %254 : vector<1x4xf32> to vector<8x4xf32>
    %256 = arith.mulf %253, %255 : vector<8x4xf32>
    %257 = arith.addf %245, %256 : vector<8x4xf32>
    %c0_129 = arith.constant 0 : index
    %c0_130 = arith.constant 0 : index
    %c117 = arith.constant 117 : index
    %c0_131 = arith.constant 0 : index
    %258 = vector.load %arg2[%c0_129, %c0_130, %c117, %c0_131] : memref<1x1x216x4xbf16, #tpu.memory_space<vmem>>, vector<1x1x8x4xbf16>
    %259 = vector.shape_cast %258 : vector<1x1x8x4xbf16> to vector<8x4xbf16>
    %260 = arith.extf %259 : vector<8x4xbf16> to vector<8x4xf32>
    %261 = vector.extract_strided_slice %18 {offsets = [1, 0], sizes = [1, 4], strides = [1, 1]} : vector<9x4xf32> to vector<1x4xf32>
    %262 = vector.broadcast %261 : vector<1x4xf32> to vector<8x4xf32>
    %263 = arith.mulf %260, %262 : vector<8x4xf32>
    %264 = arith.addf %252, %263 : vector<8x4xf32>
    %c117_132 = arith.constant 117 : index
    %c0_133 = arith.constant 0 : index
    %265 = vector.load %arg15[%c117_132, %c0_133] : memref<216x4xf32, #tpu.memory_space<vmem>>, vector<8x4xf32>
    %266 = vector.extract_strided_slice %19 {offsets = [1, 0], sizes = [1, 4], strides = [1, 1]} : vector<9x4xf32> to vector<1x4xf32>
    %267 = vector.broadcast %266 : vector<1x4xf32> to vector<8x4xf32>
    %268 = arith.mulf %265, %267 : vector<8x4xf32>
    %269 = arith.addf %257, %268 : vector<8x4xf32>
    %c0_134 = arith.constant 0 : index
    %c0_135 = arith.constant 0 : index
    %c109 = arith.constant 109 : index
    %c0_136 = arith.constant 0 : index
    %270 = vector.load %arg2[%c0_134, %c0_135, %c109, %c0_136] : memref<1x1x216x4xbf16, #tpu.memory_space<vmem>>, vector<1x1x8x4xbf16>
    %271 = vector.shape_cast %270 : vector<1x1x8x4xbf16> to vector<8x4xbf16>
    %272 = arith.extf %271 : vector<8x4xbf16> to vector<8x4xf32>
    %273 = vector.extract_strided_slice %18 {offsets = [2, 0], sizes = [1, 4], strides = [1, 1]} : vector<9x4xf32> to vector<1x4xf32>
    %274 = vector.broadcast %273 : vector<1x4xf32> to vector<8x4xf32>
    %275 = arith.mulf %272, %274 : vector<8x4xf32>
    %276 = arith.addf %264, %275 : vector<8x4xf32>
    %c109_137 = arith.constant 109 : index
    %c0_138 = arith.constant 0 : index
    %277 = vector.load %arg15[%c109_137, %c0_138] : memref<216x4xf32, #tpu.memory_space<vmem>>, vector<8x4xf32>
    %278 = vector.extract_strided_slice %19 {offsets = [2, 0], sizes = [1, 4], strides = [1, 1]} : vector<9x4xf32> to vector<1x4xf32>
    %279 = vector.broadcast %278 : vector<1x4xf32> to vector<8x4xf32>
    %280 = arith.mulf %277, %279 : vector<8x4xf32>
    %281 = arith.addf %269, %280 : vector<8x4xf32>
    %c0_139 = arith.constant 0 : index
    %c0_140 = arith.constant 0 : index
    %c126 = arith.constant 126 : index
    %c0_141 = arith.constant 0 : index
    %282 = vector.load %arg2[%c0_139, %c0_140, %c126, %c0_141] : memref<1x1x216x4xbf16, #tpu.memory_space<vmem>>, vector<1x1x8x4xbf16>
    %283 = vector.shape_cast %282 : vector<1x1x8x4xbf16> to vector<8x4xbf16>
    %284 = arith.extf %283 : vector<8x4xbf16> to vector<8x4xf32>
    %285 = vector.extract_strided_slice %18 {offsets = [3, 0], sizes = [1, 4], strides = [1, 1]} : vector<9x4xf32> to vector<1x4xf32>
    %286 = vector.broadcast %285 : vector<1x4xf32> to vector<8x4xf32>
    %287 = arith.mulf %284, %286 : vector<8x4xf32>
    %288 = arith.addf %276, %287 : vector<8x4xf32>
    %c126_142 = arith.constant 126 : index
    %c0_143 = arith.constant 0 : index
    %289 = vector.load %arg15[%c126_142, %c0_143] : memref<216x4xf32, #tpu.memory_space<vmem>>, vector<8x4xf32>
    %290 = vector.extract_strided_slice %19 {offsets = [3, 0], sizes = [1, 4], strides = [1, 1]} : vector<9x4xf32> to vector<1x4xf32>
    %291 = vector.broadcast %290 : vector<1x4xf32> to vector<8x4xf32>
    %292 = arith.mulf %289, %291 : vector<8x4xf32>
    %293 = arith.addf %281, %292 : vector<8x4xf32>
    %c0_144 = arith.constant 0 : index
    %c0_145 = arith.constant 0 : index
    %c135 = arith.constant 135 : index
    %c0_146 = arith.constant 0 : index
    %294 = vector.load %arg2[%c0_144, %c0_145, %c135, %c0_146] : memref<1x1x216x4xbf16, #tpu.memory_space<vmem>>, vector<1x1x8x4xbf16>
    %295 = vector.shape_cast %294 : vector<1x1x8x4xbf16> to vector<8x4xbf16>
    %296 = arith.extf %295 : vector<8x4xbf16> to vector<8x4xf32>
    %297 = vector.extract_strided_slice %18 {offsets = [4, 0], sizes = [1, 4], strides = [1, 1]} : vector<9x4xf32> to vector<1x4xf32>
    %298 = vector.broadcast %297 : vector<1x4xf32> to vector<8x4xf32>
    %299 = arith.mulf %296, %298 : vector<8x4xf32>
    %300 = arith.addf %288, %299 : vector<8x4xf32>
    %c135_147 = arith.constant 135 : index
    %c0_148 = arith.constant 0 : index
    %301 = vector.load %arg15[%c135_147, %c0_148] : memref<216x4xf32, #tpu.memory_space<vmem>>, vector<8x4xf32>
    %302 = vector.extract_strided_slice %19 {offsets = [4, 0], sizes = [1, 4], strides = [1, 1]} : vector<9x4xf32> to vector<1x4xf32>
    %303 = vector.broadcast %302 : vector<1x4xf32> to vector<8x4xf32>
    %304 = arith.mulf %301, %303 : vector<8x4xf32>
    %305 = arith.addf %293, %304 : vector<8x4xf32>
    %c0_149 = arith.constant 0 : index
    %c0_150 = arith.constant 0 : index
    %c127 = arith.constant 127 : index
    %c0_151 = arith.constant 0 : index
    %306 = vector.load %arg2[%c0_149, %c0_150, %c127, %c0_151] : memref<1x1x216x4xbf16, #tpu.memory_space<vmem>>, vector<1x1x8x4xbf16>
    %307 = vector.shape_cast %306 : vector<1x1x8x4xbf16> to vector<8x4xbf16>
    %308 = arith.extf %307 : vector<8x4xbf16> to vector<8x4xf32>
    %309 = vector.extract_strided_slice %18 {offsets = [5, 0], sizes = [1, 4], strides = [1, 1]} : vector<9x4xf32> to vector<1x4xf32>
    %310 = vector.broadcast %309 : vector<1x4xf32> to vector<8x4xf32>
    %311 = arith.mulf %308, %310 : vector<8x4xf32>
    %312 = arith.addf %300, %311 : vector<8x4xf32>
    %c127_152 = arith.constant 127 : index
    %c0_153 = arith.constant 0 : index
    %313 = vector.load %arg15[%c127_152, %c0_153] : memref<216x4xf32, #tpu.memory_space<vmem>>, vector<8x4xf32>
    %314 = vector.extract_strided_slice %19 {offsets = [5, 0], sizes = [1, 4], strides = [1, 1]} : vector<9x4xf32> to vector<1x4xf32>
    %315 = vector.broadcast %314 : vector<1x4xf32> to vector<8x4xf32>
    %316 = arith.mulf %313, %315 : vector<8x4xf32>
    %317 = arith.addf %305, %316 : vector<8x4xf32>
    %c0_154 = arith.constant 0 : index
    %c0_155 = arith.constant 0 : index
    %c144 = arith.constant 144 : index
    %c0_156 = arith.constant 0 : index
    %318 = vector.load %arg2[%c0_154, %c0_155, %c144, %c0_156] : memref<1x1x216x4xbf16, #tpu.memory_space<vmem>>, vector<1x1x8x4xbf16>
    %319 = vector.shape_cast %318 : vector<1x1x8x4xbf16> to vector<8x4xbf16>
    %320 = arith.extf %319 : vector<8x4xbf16> to vector<8x4xf32>
    %321 = vector.extract_strided_slice %18 {offsets = [6, 0], sizes = [1, 4], strides = [1, 1]} : vector<9x4xf32> to vector<1x4xf32>
    %322 = vector.broadcast %321 : vector<1x4xf32> to vector<8x4xf32>
    %323 = arith.mulf %320, %322 : vector<8x4xf32>
    %324 = arith.addf %312, %323 : vector<8x4xf32>
    %c144_157 = arith.constant 144 : index
    %c0_158 = arith.constant 0 : index
    %325 = vector.load %arg15[%c144_157, %c0_158] : memref<216x4xf32, #tpu.memory_space<vmem>>, vector<8x4xf32>
    %326 = vector.extract_strided_slice %19 {offsets = [6, 0], sizes = [1, 4], strides = [1, 1]} : vector<9x4xf32> to vector<1x4xf32>
    %327 = vector.broadcast %326 : vector<1x4xf32> to vector<8x4xf32>
    %328 = arith.mulf %325, %327 : vector<8x4xf32>
    %329 = arith.addf %317, %328 : vector<8x4xf32>
    %c0_159 = arith.constant 0 : index
    %c0_160 = arith.constant 0 : index
    %c153 = arith.constant 153 : index
    %c0_161 = arith.constant 0 : index
    %330 = vector.load %arg2[%c0_159, %c0_160, %c153, %c0_161] : memref<1x1x216x4xbf16, #tpu.memory_space<vmem>>, vector<1x1x8x4xbf16>
    %331 = vector.shape_cast %330 : vector<1x1x8x4xbf16> to vector<8x4xbf16>
    %332 = arith.extf %331 : vector<8x4xbf16> to vector<8x4xf32>
    %333 = vector.extract_strided_slice %18 {offsets = [7, 0], sizes = [1, 4], strides = [1, 1]} : vector<9x4xf32> to vector<1x4xf32>
    %334 = vector.broadcast %333 : vector<1x4xf32> to vector<8x4xf32>
    %335 = arith.mulf %332, %334 : vector<8x4xf32>
    %336 = arith.addf %324, %335 : vector<8x4xf32>
    %c153_162 = arith.constant 153 : index
    %c0_163 = arith.constant 0 : index
    %337 = vector.load %arg15[%c153_162, %c0_163] : memref<216x4xf32, #tpu.memory_space<vmem>>, vector<8x4xf32>
    %338 = vector.extract_strided_slice %19 {offsets = [7, 0], sizes = [1, 4], strides = [1, 1]} : vector<9x4xf32> to vector<1x4xf32>
    %339 = vector.broadcast %338 : vector<1x4xf32> to vector<8x4xf32>
    %340 = arith.mulf %337, %339 : vector<8x4xf32>
    %341 = arith.addf %329, %340 : vector<8x4xf32>
    %c0_164 = arith.constant 0 : index
    %c0_165 = arith.constant 0 : index
    %c145 = arith.constant 145 : index
    %c0_166 = arith.constant 0 : index
    %342 = vector.load %arg2[%c0_164, %c0_165, %c145, %c0_166] : memref<1x1x216x4xbf16, #tpu.memory_space<vmem>>, vector<1x1x8x4xbf16>
    %343 = vector.shape_cast %342 : vector<1x1x8x4xbf16> to vector<8x4xbf16>
    %344 = arith.extf %343 : vector<8x4xbf16> to vector<8x4xf32>
    %345 = vector.extract_strided_slice %18 {offsets = [8, 0], sizes = [1, 4], strides = [1, 1]} : vector<9x4xf32> to vector<1x4xf32>
    %346 = vector.broadcast %345 : vector<1x4xf32> to vector<8x4xf32>
    %347 = arith.mulf %344, %346 : vector<8x4xf32>
    %348 = arith.addf %336, %347 : vector<8x4xf32>
    %c145_167 = arith.constant 145 : index
    %c0_168 = arith.constant 0 : index
    %349 = vector.load %arg15[%c145_167, %c0_168] : memref<216x4xf32, #tpu.memory_space<vmem>>, vector<8x4xf32>
    %350 = vector.extract_strided_slice %19 {offsets = [8, 0], sizes = [1, 4], strides = [1, 1]} : vector<9x4xf32> to vector<1x4xf32>
    %351 = vector.broadcast %350 : vector<1x4xf32> to vector<8x4xf32>
    %352 = arith.mulf %349, %351 : vector<8x4xf32>
    %353 = arith.addf %341, %352 : vector<8x4xf32>
    %c16 = arith.constant 16 : index
    %c0_169 = arith.constant 0 : index
    %354 = vector.load %arg16[%c16, %c0_169] : memref<32x4xf32, #tpu.memory_space<vmem>>, vector<8x4xf32>
    tpu.vector_store %arg16[%c16, %c0_169], %348 {strides = array<i32>} : memref<32x4xf32, #tpu.memory_space<vmem>>, vector<8x4xf32>,
    %c16_170 = arith.constant 16 : index
    %c0_171 = arith.constant 0 : index
    %355 = vector.load %arg17[%c16_170, %c0_171] : memref<32x4xf32, #tpu.memory_space<vmem>>, vector<8x4xf32>
    tpu.vector_store %arg17[%c16_170, %c0_171], %353 {strides = array<i32>} : memref<32x4xf32, #tpu.memory_space<vmem>>, vector<8x4xf32>,
    %cst_172 = arith.constant 0.000000e+00 : f32
    %356 = vector.broadcast %cst_172 : f32 to vector<8x4xf32>
    %cst_173 = arith.constant 0.000000e+00 : f32
    %357 = vector.broadcast %cst_173 : f32 to vector<8x4xf32>
    %c0_174 = arith.constant 0 : index
    %c0_175 = arith.constant 0 : index
    %c162 = arith.constant 162 : index
    %c0_176 = arith.constant 0 : index
    %358 = vector.load %arg2[%c0_174, %c0_175, %c162, %c0_176] : memref<1x1x216x4xbf16, #tpu.memory_space<vmem>>, vector<1x1x8x4xbf16>
    %359 = vector.shape_cast %358 : vector<1x1x8x4xbf16> to vector<8x4xbf16>
    %360 = arith.extf %359 : vector<8x4xbf16> to vector<8x4xf32>
    %361 = vector.extract_strided_slice %18 {offsets = [0, 0], sizes = [1, 4], strides = [1, 1]} : vector<9x4xf32> to vector<1x4xf32>
    %362 = vector.broadcast %361 : vector<1x4xf32> to vector<8x4xf32>
    %363 = arith.mulf %360, %362 : vector<8x4xf32>
    %364 = arith.addf %356, %363 : vector<8x4xf32>
    %c162_177 = arith.constant 162 : index
    %c0_178 = arith.constant 0 : index
    %365 = vector.load %arg15[%c162_177, %c0_178] : memref<216x4xf32, #tpu.memory_space<vmem>>, vector<8x4xf32>
    %366 = vector.extract_strided_slice %19 {offsets = [0, 0], sizes = [1, 4], strides = [1, 1]} : vector<9x4xf32> to vector<1x4xf32>
    %367 = vector.broadcast %366 : vector<1x4xf32> to vector<8x4xf32>
    %368 = arith.mulf %365, %367 : vector<8x4xf32>
    %369 = arith.addf %357, %368 : vector<8x4xf32>
    %c0_179 = arith.constant 0 : index
    %c0_180 = arith.constant 0 : index
    %c171 = arith.constant 171 : index
    %c0_181 = arith.constant 0 : index
    %370 = vector.load %arg2[%c0_179, %c0_180, %c171, %c0_181] : memref<1x1x216x4xbf16, #tpu.memory_space<vmem>>, vector<1x1x8x4xbf16>
    %371 = vector.shape_cast %370 : vector<1x1x8x4xbf16> to vector<8x4xbf16>
    %372 = arith.extf %371 : vector<8x4xbf16> to vector<8x4xf32>
    %373 = vector.extract_strided_slice %18 {offsets = [1, 0], sizes = [1, 4], strides = [1, 1]} : vector<9x4xf32> to vector<1x4xf32>
    %374 = vector.broadcast %373 : vector<1x4xf32> to vector<8x4xf32>
    %375 = arith.mulf %372, %374 : vector<8x4xf32>
    %376 = arith.addf %364, %375 : vector<8x4xf32>
    %c171_182 = arith.constant 171 : index
    %c0_183 = arith.constant 0 : index
    %377 = vector.load %arg15[%c171_182, %c0_183] : memref<216x4xf32, #tpu.memory_space<vmem>>, vector<8x4xf32>
    %378 = vector.extract_strided_slice %19 {offsets = [1, 0], sizes = [1, 4], strides = [1, 1]} : vector<9x4xf32> to vector<1x4xf32>
    %379 = vector.broadcast %378 : vector<1x4xf32> to vector<8x4xf32>
    %380 = arith.mulf %377, %379 : vector<8x4xf32>
    %381 = arith.addf %369, %380 : vector<8x4xf32>
    %c0_184 = arith.constant 0 : index
    %c0_185 = arith.constant 0 : index
    %c163 = arith.constant 163 : index
    %c0_186 = arith.constant 0 : index
    %382 = vector.load %arg2[%c0_184, %c0_185, %c163, %c0_186] : memref<1x1x216x4xbf16, #tpu.memory_space<vmem>>, vector<1x1x8x4xbf16>
    %383 = vector.shape_cast %382 : vector<1x1x8x4xbf16> to vector<8x4xbf16>
    %384 = arith.extf %383 : vector<8x4xbf16> to vector<8x4xf32>
    %385 = vector.extract_strided_slice %18 {offsets = [2, 0], sizes = [1, 4], strides = [1, 1]} : vector<9x4xf32> to vector<1x4xf32>
    %386 = vector.broadcast %385 : vector<1x4xf32> to vector<8x4xf32>
    %387 = arith.mulf %384, %386 : vector<8x4xf32>
    %388 = arith.addf %376, %387 : vector<8x4xf32>
    %c163_187 = arith.constant 163 : index
    %c0_188 = arith.constant 0 : index
    %389 = vector.load %arg15[%c163_187, %c0_188] : memref<216x4xf32, #tpu.memory_space<vmem>>, vector<8x4xf32>
    %390 = vector.extract_strided_slice %19 {offsets = [2, 0], sizes = [1, 4], strides = [1, 1]} : vector<9x4xf32> to vector<1x4xf32>
    %391 = vector.broadcast %390 : vector<1x4xf32> to vector<8x4xf32>
    %392 = arith.mulf %389, %391 : vector<8x4xf32>
    %393 = arith.addf %381, %392 : vector<8x4xf32>
    %c0_189 = arith.constant 0 : index
    %c0_190 = arith.constant 0 : index
    %c180 = arith.constant 180 : index
    %c0_191 = arith.constant 0 : index
    %394 = vector.load %arg2[%c0_189, %c0_190, %c180, %c0_191] : memref<1x1x216x4xbf16, #tpu.memory_space<vmem>>, vector<1x1x8x4xbf16>
    %395 = vector.shape_cast %394 : vector<1x1x8x4xbf16> to vector<8x4xbf16>
    %396 = arith.extf %395 : vector<8x4xbf16> to vector<8x4xf32>
    %397 = vector.extract_strided_slice %18 {offsets = [3, 0], sizes = [1, 4], strides = [1, 1]} : vector<9x4xf32> to vector<1x4xf32>
    %398 = vector.broadcast %397 : vector<1x4xf32> to vector<8x4xf32>
    %399 = arith.mulf %396, %398 : vector<8x4xf32>
    %400 = arith.addf %388, %399 : vector<8x4xf32>
    %c180_192 = arith.constant 180 : index
    %c0_193 = arith.constant 0 : index
    %401 = vector.load %arg15[%c180_192, %c0_193] : memref<216x4xf32, #tpu.memory_space<vmem>>, vector<8x4xf32>
    %402 = vector.extract_strided_slice %19 {offsets = [3, 0], sizes = [1, 4], strides = [1, 1]} : vector<9x4xf32> to vector<1x4xf32>
    %403 = vector.broadcast %402 : vector<1x4xf32> to vector<8x4xf32>
    %404 = arith.mulf %401, %403 : vector<8x4xf32>
    %405 = arith.addf %393, %404 : vector<8x4xf32>
    %c0_194 = arith.constant 0 : index
    %c0_195 = arith.constant 0 : index
    %c189 = arith.constant 189 : index
    %c0_196 = arith.constant 0 : index
    %406 = vector.load %arg2[%c0_194, %c0_195, %c189, %c0_196] : memref<1x1x216x4xbf16, #tpu.memory_space<vmem>>, vector<1x1x8x4xbf16>
    %407 = vector.shape_cast %406 : vector<1x1x8x4xbf16> to vector<8x4xbf16>
    %408 = arith.extf %407 : vector<8x4xbf16> to vector<8x4xf32>
    %409 = vector.extract_strided_slice %18 {offsets = [4, 0], sizes = [1, 4], strides = [1, 1]} : vector<9x4xf32> to vector<1x4xf32>
    %410 = vector.broadcast %409 : vector<1x4xf32> to vector<8x4xf32>
    %411 = arith.mulf %408, %410 : vector<8x4xf32>
    %412 = arith.addf %400, %411 : vector<8x4xf32>
    %c189_197 = arith.constant 189 : index
    %c0_198 = arith.constant 0 : index
    %413 = vector.load %arg15[%c189_197, %c0_198] : memref<216x4xf32, #tpu.memory_space<vmem>>, vector<8x4xf32>
    %414 = vector.extract_strided_slice %19 {offsets = [4, 0], sizes = [1, 4], strides = [1, 1]} : vector<9x4xf32> to vector<1x4xf32>
    %415 = vector.broadcast %414 : vector<1x4xf32> to vector<8x4xf32>
    %416 = arith.mulf %413, %415 : vector<8x4xf32>
    %417 = arith.addf %405, %416 : vector<8x4xf32>
    %c0_199 = arith.constant 0 : index
    %c0_200 = arith.constant 0 : index
    %c181 = arith.constant 181 : index
    %c0_201 = arith.constant 0 : index
    %418 = vector.load %arg2[%c0_199, %c0_200, %c181, %c0_201] : memref<1x1x216x4xbf16, #tpu.memory_space<vmem>>, vector<1x1x8x4xbf16>
    %419 = vector.shape_cast %418 : vector<1x1x8x4xbf16> to vector<8x4xbf16>
    %420 = arith.extf %419 : vector<8x4xbf16> to vector<8x4xf32>
    %421 = vector.extract_strided_slice %18 {offsets = [5, 0], sizes = [1, 4], strides = [1, 1]} : vector<9x4xf32> to vector<1x4xf32>
    %422 = vector.broadcast %421 : vector<1x4xf32> to vector<8x4xf32>
    %423 = arith.mulf %420, %422 : vector<8x4xf32>
    %424 = arith.addf %412, %423 : vector<8x4xf32>
    %c181_202 = arith.constant 181 : index
    %c0_203 = arith.constant 0 : index
    %425 = vector.load %arg15[%c181_202, %c0_203] : memref<216x4xf32, #tpu.memory_space<vmem>>, vector<8x4xf32>
    %426 = vector.extract_strided_slice %19 {offsets = [5, 0], sizes = [1, 4], strides = [1, 1]} : vector<9x4xf32> to vector<1x4xf32>
    %427 = vector.broadcast %426 : vector<1x4xf32> to vector<8x4xf32>
    %428 = arith.mulf %425, %427 : vector<8x4xf32>
    %429 = arith.addf %417, %428 : vector<8x4xf32>
    %c0_204 = arith.constant 0 : index
    %c0_205 = arith.constant 0 : index
    %c198 = arith.constant 198 : index
    %c0_206 = arith.constant 0 : index
    %430 = vector.load %arg2[%c0_204, %c0_205, %c198, %c0_206] : memref<1x1x216x4xbf16, #tpu.memory_space<vmem>>, vector<1x1x8x4xbf16>
    %431 = vector.shape_cast %430 : vector<1x1x8x4xbf16> to vector<8x4xbf16>
    %432 = arith.extf %431 : vector<8x4xbf16> to vector<8x4xf32>
    %433 = vector.extract_strided_slice %18 {offsets = [6, 0], sizes = [1, 4], strides = [1, 1]} : vector<9x4xf32> to vector<1x4xf32>
    %434 = vector.broadcast %433 : vector<1x4xf32> to vector<8x4xf32>
    %435 = arith.mulf %432, %434 : vector<8x4xf32>
    %436 = arith.addf %424, %435 : vector<8x4xf32>
    %c198_207 = arith.constant 198 : index
    %c0_208 = arith.constant 0 : index
    %437 = vector.load %arg15[%c198_207, %c0_208] : memref<216x4xf32, #tpu.memory_space<vmem>>, vector<8x4xf32>
    %438 = vector.extract_strided_slice %19 {offsets = [6, 0], sizes = [1, 4], strides = [1, 1]} : vector<9x4xf32> to vector<1x4xf32>
    %439 = vector.broadcast %438 : vector<1x4xf32> to vector<8x4xf32>
    %440 = arith.mulf %437, %439 : vector<8x4xf32>
    %441 = arith.addf %429, %440 : vector<8x4xf32>
    %c0_209 = arith.constant 0 : index
    %c0_210 = arith.constant 0 : index
    %c207 = arith.constant 207 : index
    %c0_211 = arith.constant 0 : index
    %442 = vector.load %arg2[%c0_209, %c0_210, %c207, %c0_211] : memref<1x1x216x4xbf16, #tpu.memory_space<vmem>>, vector<1x1x8x4xbf16>
    %443 = vector.shape_cast %442 : vector<1x1x8x4xbf16> to vector<8x4xbf16>
    %444 = arith.extf %443 : vector<8x4xbf16> to vector<8x4xf32>
    %445 = vector.extract_strided_slice %18 {offsets = [7, 0], sizes = [1, 4], strides = [1, 1]} : vector<9x4xf32> to vector<1x4xf32>
    %446 = vector.broadcast %445 : vector<1x4xf32> to vector<8x4xf32>
    %447 = arith.mulf %444, %446 : vector<8x4xf32>
    %448 = arith.addf %436, %447 : vector<8x4xf32>
    %c207_212 = arith.constant 207 : index
    %c0_213 = arith.constant 0 : index
    %449 = vector.load %arg15[%c207_212, %c0_213] : memref<216x4xf32, #tpu.memory_space<vmem>>, vector<8x4xf32>
    %450 = vector.extract_strided_slice %19 {offsets = [7, 0], sizes = [1, 4], strides = [1, 1]} : vector<9x4xf32> to vector<1x4xf32>
    %451 = vector.broadcast %450 : vector<1x4xf32> to vector<8x4xf32>
    %452 = arith.mulf %449, %451 : vector<8x4xf32>
    %453 = arith.addf %441, %452 : vector<8x4xf32>
    %c0_214 = arith.constant 0 : index
    %c0_215 = arith.constant 0 : index
    %c199 = arith.constant 199 : index
    %c0_216 = arith.constant 0 : index
    %454 = vector.load %arg2[%c0_214, %c0_215, %c199, %c0_216] : memref<1x1x216x4xbf16, #tpu.memory_space<vmem>>, vector<1x1x8x4xbf16>
    %455 = vector.shape_cast %454 : vector<1x1x8x4xbf16> to vector<8x4xbf16>
    %456 = arith.extf %455 : vector<8x4xbf16> to vector<8x4xf32>
    %457 = vector.extract_strided_slice %18 {offsets = [8, 0], sizes = [1, 4], strides = [1, 1]} : vector<9x4xf32> to vector<1x4xf32>
    %458 = vector.broadcast %457 : vector<1x4xf32> to vector<8x4xf32>
    %459 = arith.mulf %456, %458 : vector<8x4xf32>
    %460 = arith.addf %448, %459 : vector<8x4xf32>
    %c199_217 = arith.constant 199 : index
    %c0_218 = arith.constant 0 : index
    %461 = vector.load %arg15[%c199_217, %c0_218] : memref<216x4xf32, #tpu.memory_space<vmem>>, vector<8x4xf32>
    %462 = vector.extract_strided_slice %19 {offsets = [8, 0], sizes = [1, 4], strides = [1, 1]} : vector<9x4xf32> to vector<1x4xf32>
    %463 = vector.broadcast %462 : vector<1x4xf32> to vector<8x4xf32>
    %464 = arith.mulf %461, %463 : vector<8x4xf32>
    %465 = arith.addf %453, %464 : vector<8x4xf32>
    %c24 = arith.constant 24 : index
    %c0_219 = arith.constant 0 : index
    %466 = vector.load %arg16[%c24, %c0_219] : memref<32x4xf32, #tpu.memory_space<vmem>>, vector<8x4xf32>
    tpu.vector_store %arg16[%c24, %c0_219], %460 {strides = array<i32>} : memref<32x4xf32, #tpu.memory_space<vmem>>, vector<8x4xf32>,
    %c24_220 = arith.constant 24 : index
    %c0_221 = arith.constant 0 : index
    %467 = vector.load %arg17[%c24_220, %c0_221] : memref<32x4xf32, #tpu.memory_space<vmem>>, vector<8x4xf32>
    tpu.vector_store %arg17[%c24_220, %c0_221], %465 {strides = array<i32>} : memref<32x4xf32, #tpu.memory_space<vmem>>, vector<8x4xf32>,
    %c0_222 = arith.constant 0 : index
    %c0_223 = arith.constant 0 : index
    %468 = vector.load %arg16[%c0_222, %c0_223] : memref<32x4xf32, #tpu.memory_space<vmem>>, vector<32x4xf32>
    %c0_224 = arith.constant 0 : index
    %c0_225 = arith.constant 0 : index
    %469 = vector.load %arg5[%c0_224, %c0_225] : memref<2x4xf32, #tpu.memory_space<vmem>>, vector<1x4xf32>
    %470 = vector.broadcast %469 : vector<1x4xf32> to vector<32x4xf32>
    %471 = arith.mulf %468, %470 : vector<32x4xf32>
    %c1_226 = arith.constant 1 : index
    %c0_227 = arith.constant 0 : index
    %472 = vector.load %arg5[%c1_226, %c0_227] : memref<2x4xf32, #tpu.memory_space<vmem>>, vector<1x4xf32>
    %473 = vector.broadcast %472 : vector<1x4xf32> to vector<32x4xf32>
    %474 = arith.addf %471, %473 : vector<32x4xf32>
    %c0_228 = arith.constant 0 : index
    %c0_229 = arith.constant 0 : index
    %475 = vector.load %arg6[%c0_228, %c0_229] : memref<4x4xbf16, #tpu.memory_space<vmem>>, vector<4x4xbf16>
    %476 = arith.extf %475 : vector<4x4xbf16> to vector<4x4xf32>
    %cst_230 = arith.constant dense<0.000000e+00> : vector<32x4xf32>
    %477 = tpu.matmul %474, %476, %cst_230 {dimension_numbers = #tpu.dot_dimension_numbers<[1], [0], [0], [1], [0, 0, 1, 1], [], []>} : vector<32x4xf32>, vector<4x4xf32>, vector<32x4xf32> -> vector<32x4xf32>
    %c0_231 = arith.constant 0 : index
    %c0_232 = arith.constant 0 : index
    %478 = vector.load %arg7[%c0_231, %c0_232] : memref<2x4xf32, #tpu.memory_space<vmem>>, vector<1x4xf32>
    %479 = vector.broadcast %478 : vector<1x4xf32> to vector<32x4xf32>
    %480 = arith.mulf %477, %479 : vector<32x4xf32>
    %c1_233 = arith.constant 1 : index
    %c0_234 = arith.constant 0 : index
    %481 = vector.load %arg7[%c1_233, %c0_234] : memref<2x4xf32, #tpu.memory_space<vmem>>, vector<1x4xf32>
    %482 = vector.broadcast %481 : vector<1x4xf32> to vector<32x4xf32>
    %483 = arith.addf %480, %482 : vector<32x4xf32>
    %cst_235 = arith.constant 0.000000e+00 : f32
    %484 = vector.broadcast %cst_235 : f32 to vector<32x4xf32>
    %485 = arith.maximumf %483, %484 : vector<32x4xf32>
    %c0_236 = arith.constant 0 : index
    %c0_237 = arith.constant 0 : index
    %486 = vector.load %arg17[%c0_236, %c0_237] : memref<32x4xf32, #tpu.memory_space<vmem>>, vector<32x4xf32>
    %c0_238 = arith.constant 0 : index
    %c0_239 = arith.constant 0 : index
    %487 = vector.load %arg11[%c0_238, %c0_239] : memref<2x4xf32, #tpu.memory_space<vmem>>, vector<1x4xf32>
    %488 = vector.broadcast %487 : vector<1x4xf32> to vector<32x4xf32>
    %489 = arith.mulf %486, %488 : vector<32x4xf32>
    %c1_240 = arith.constant 1 : index
    %c0_241 = arith.constant 0 : index
    %490 = vector.load %arg11[%c1_240, %c0_241] : memref<2x4xf32, #tpu.memory_space<vmem>>, vector<1x4xf32>
    %491 = vector.broadcast %490 : vector<1x4xf32> to vector<32x4xf32>
    %492 = arith.addf %489, %491 : vector<32x4xf32>
    %c0_242 = arith.constant 0 : index
    %c0_243 = arith.constant 0 : index
    %493 = vector.load %arg12[%c0_242, %c0_243] : memref<4x4xbf16, #tpu.memory_space<vmem>>, vector<4x4xbf16>
    %494 = arith.extf %493 : vector<4x4xbf16> to vector<4x4xf32>
    %cst_244 = arith.constant dense<0.000000e+00> : vector<32x4xf32>
    %495 = tpu.matmul %492, %494, %cst_244 {dimension_numbers = #tpu.dot_dimension_numbers<[1], [0], [0], [1], [0, 0, 1, 1], [], []>} : vector<32x4xf32>, vector<4x4xf32>, vector<32x4xf32> -> vector<32x4xf32>
    %c0_245 = arith.constant 0 : index
    %c0_246 = arith.constant 0 : index
    %496 = vector.load %arg13[%c0_245, %c0_246] : memref<2x4xf32, #tpu.memory_space<vmem>>, vector<1x4xf32>
    %497 = vector.broadcast %496 : vector<1x4xf32> to vector<32x4xf32>
    %498 = arith.mulf %495, %497 : vector<32x4xf32>
    %c1_247 = arith.constant 1 : index
    %c0_248 = arith.constant 0 : index
    %499 = vector.load %arg13[%c1_247, %c0_248] : memref<2x4xf32, #tpu.memory_space<vmem>>, vector<1x4xf32>
    %500 = vector.broadcast %499 : vector<1x4xf32> to vector<32x4xf32>
    %501 = arith.addf %498, %500 : vector<32x4xf32>
    %cst_249 = arith.constant 0.000000e+00 : f32
    %502 = vector.broadcast %cst_249 : f32 to vector<32x4xf32>
    %503 = arith.maximumf %501, %502 : vector<32x4xf32>
    %c0_250 = arith.constant 0 : index
    %c0_251 = arith.constant 0 : index
    %c0_252 = arith.constant 0 : index
    %c0_253 = arith.constant 0 : index
    %504 = vector.load %arg14[%c0_250, %c0_251, %c0_252, %c0_253] : memref<1x1x32x8xf32, #tpu.memory_space<vmem>>, vector<1x1x32x4xf32>
    %505 = vector.shape_cast %504 : vector<1x1x32x4xf32> to vector<32x4xf32>
    %506 = vector.shape_cast %485 : vector<32x4xf32> to vector<1x1x32x4xf32>
    tpu.vector_store %arg14[%c0_250, %c0_251, %c0_252, %c0_253], %506 {strides = array<i32>} : memref<1x1x32x8xf32, #tpu.memory_space<vmem>>, vector<1x1x32x4xf32>,
    %c0_254 = arith.constant 0 : index
    %c0_255 = arith.constant 0 : index
    %c0_256 = arith.constant 0 : index
    %c4 = arith.constant 4 : index
    %507 = vector.load %arg14[%c0_254, %c0_255, %c0_256, %c4] : memref<1x1x32x8xf32, #tpu.memory_space<vmem>>, vector<1x1x32x4xf32>
    %508 = vector.shape_cast %507 : vector<1x1x32x4xf32> to vector<32x4xf32>
    %509 = vector.shape_cast %503 : vector<32x4xf32> to vector<1x1x32x4xf32>
    tpu.vector_store %arg14[%c0_254, %c0_255, %c0_256, %c4], %509 {strides = array<i32>} : memref<1x1x32x8xf32, #tpu.memory_space<vmem>>, vector<1x1x32x4xf32>,
    return
  }
  func.func @transform_0(%arg0: i32, %arg1: i32) -> (i32, i32, i32, i32) {
    %c0_i32 = arith.constant 0 : i32
    %c0_i32_0 = arith.constant 0 : i32
    %c0_i32_1 = arith.constant 0 : i32
    return %arg0, %arg1, %c0_i32, %c0_i32_0 : i32, i32, i32, i32
  }
  func.func @transform_1(%arg0: i32, %arg1: i32) -> (i32, i32, i32, i32) {
    %c0_i32 = arith.constant 0 : i32
    %c0_i32_0 = arith.constant 0 : i32
    %c0_i32_1 = arith.constant 0 : i32
    return %arg0, %arg1, %c0_i32, %c0_i32_0 : i32, i32, i32, i32
  }
  func.func @transform_2(%arg0: i32, %arg1: i32) -> (i32, i32) {
    %c0_i32 = arith.constant 0 : i32
    %c0_i32_0 = arith.constant 0 : i32
    %c0_i32_1 = arith.constant 0 : i32
    return %c0_i32, %c0_i32_0 : i32, i32
  }
  func.func @transform_3(%arg0: i32, %arg1: i32) -> (i32, i32) {
    %c0_i32 = arith.constant 0 : i32
    %c0_i32_0 = arith.constant 0 : i32
    %c0_i32_1 = arith.constant 0 : i32
    return %c0_i32, %c0_i32_0 : i32, i32
  }
  func.func @transform_4(%arg0: i32, %arg1: i32) -> (i32, i32) {
    %c0_i32 = arith.constant 0 : i32
    %c0_i32_0 = arith.constant 0 : i32
    %c0_i32_1 = arith.constant 0 : i32
    return %c0_i32, %c0_i32_0 : i32, i32
  }
  func.func @transform_5(%arg0: i32, %arg1: i32) -> (i32, i32) {
    %c0_i32 = arith.constant 0 : i32
    %c0_i32_0 = arith.constant 0 : i32
    %c0_i32_1 = arith.constant 0 : i32
    return %c0_i32, %c0_i32_0 : i32, i32
  }
  func.func @transform_6(%arg0: i32, %arg1: i32) -> (i32, i32) {
    %c0_i32 = arith.constant 0 : i32
    %c0_i32_0 = arith.constant 0 : i32
    %c0_i32_1 = arith.constant 0 : i32
    return %c0_i32, %c0_i32_0 : i32, i32
  }
  func.func @transform_7(%arg0: i32, %arg1: i32) -> (i32, i32) {
    %c0_i32 = arith.constant 0 : i32
    %c0_i32_0 = arith.constant 0 : i32
    %c0_i32_1 = arith.constant 0 : i32
    return %c0_i32, %c0_i32_0 : i32, i32
  }
  func.func @transform_8(%arg0: i32, %arg1: i32) -> (i32, i32) {
    %c0_i32 = arith.constant 0 : i32
    %c0_i32_0 = arith.constant 0 : i32
    %c0_i32_1 = arith.constant 0 : i32
    return %c0_i32, %c0_i32_0 : i32, i32
  }
  func.func @transform_9(%arg0: i32, %arg1: i32) -> (i32, i32) {
    %c0_i32 = arith.constant 0 : i32
    %c0_i32_0 = arith.constant 0 : i32
    %c0_i32_1 = arith.constant 0 : i32
    return %c0_i32, %c0_i32_0 : i32, i32
  }
  func.func @transform_10(%arg0: i32, %arg1: i32) -> (i32, i32) {
    %c0_i32 = arith.constant 0 : i32
    %c0_i32_0 = arith.constant 0 : i32
    %c0_i32_1 = arith.constant 0 : i32
    return %c0_i32, %c0_i32_0 : i32, i32
  }
  func.func @transform_11(%arg0: i32, %arg1: i32) -> (i32, i32) {
    %c0_i32 = arith.constant 0 : i32
    %c0_i32_0 = arith.constant 0 : i32
    %c0_i32_1 = arith.constant 0 : i32
    return %c0_i32, %c0_i32_0 : i32, i32
  }
  func.func @transform_12(%arg0: i32, %arg1: i32) -> (i32, i32, i32, i32) {
    %c0_i32 = arith.constant 0 : i32
    %c0_i32_0 = arith.constant 0 : i32
    %c0_i32_1 = arith.constant 0 : i32
    return %arg0, %arg1, %c0_i32, %c0_i32_0 : i32, i32, i32, i32
  }
}

</mosaic_0001>

<bundles_post_ra>
// kernel: down_block_forward.1
= control target key start
LH: loop header
LB: loop body
LE: loop exit
PB: predicated region body
PF: predicated region fallthrough
CT: control target
= control target key end

     0   :  { %s2632_s21 = smov 0   ;;  %s2634_s22 = smov 0   ;;  %s3299_s0 = inlined_call_operand.vmem [shape: bf16[2,2,216,4], index: 0, kind: input, shape index: {}]   ;;  %s3300_s1 = inlined_call_operand.vmem [shape: bf16[2,2,216,1], index: 1, kind: input, shape index: {}]   ;;  %s3301_s2 = inlined_call_operand.vmem [shape: f32[9,4], index: 2, kind: input, shape index: {}]   ;;  %s3302_s3 = inlined_call_operand.vmem [shape: f32[2,4], index: 3, kind: input, shape index: {}]   ;;  %s3303_s4 = inlined_call_operand.vmem [shape: bf16[4,4], index: 4, kind: input, shape index: {}]   ;;  %s3304_s5 = inlined_call_operand.vmem [shape: f32[2,4], index: 5, kind: input, shape index: {}]   ;;  %s3305_s6 = inlined_call_operand.vmem [shape: bf16[4,4], index: 6, kind: input, shape index: {}]   ;;  %s3306_s7 = inlined_call_operand.vmem [shape: f32[2,4], index: 7, kind: input, shape index: {}]   ;;  %s3307_s8 = inlined_call_operand.vmem [shape: f32[9,4], index: 8, kind: input, shape index: {}]   ;;  %s3308_s9 = inlined_call_operand.vmem [shape: f32[2,4], index: 9, kind: input, shape index: {}]   ;;  %s3309_s10 = inlined_call_operand.vmem [shape: bf16[4,4], index: 10, kind: input, shape index: {}]   ;;  %s3310_s11 = inlined_call_operand.vmem [shape: f32[2,4], index: 11, kind: input, shape index: {}]   ;;  %s3311_s12 = inlined_call_operand.vmem [shape: f32[2,2,32,8], index: 12, kind: output, shape index: {}]  }
   0x1   :  { %s2636_s23 = smov 0   ;;  %s2638_s24 = smov 0  }
   0x2   :  { %s2640_s25 = smov 0  }
   0x3 LB: > { %s31_s26 = sadd.s32 1, %s2555_s23  ;;  %s34_s27 = sadd.s32 1, %s2559_s24  ;;  %s2563_s25 = sphi %s2640_s25, %s22_s25   ;;  %s2559_s24 = sphi %s2638_s24, %s3315_s24   ;;  %s2555_s23 = sphi %s2636_s23, %s3314_s23   ;;  %s2551_s22 = sphi %s2634_s22, %s3313_s22   ;;  %s2547_s21 = sphi %s2632_s21, %s3312_s21  }
   0x4   : > { %p32_p0 = scmp.ge.s32.totalorder %s31_s26, 2  ;;  %p2203_p1 = scmp.ge.s32.totalorder %s2563_s25, 1 }
   0x5   : > { %p398_p2 = scmp.lt.s32.totalorder %s2563_s25, 5 }
   0x6   : > { %s3317_s26 = smov (%p32_p0, %s31_s26), 0  ;;  %s3319_s27 = smov (!%p32_p0, %s34_s27), %s2559_s24 }
   0x7   : > { %p399_p3 = pnand %p2203_p1, %p398_p2  ;;  %p36_p4 = scmp.ge.s32.totalorder %s3319_s27, 2 }
   0x8   : > { %v512_v0 = vld [vmem:[%s3305_s6] sm:$0x3] (!%p399_p3)  ;;  %vm624_vm0 = vcmask (!%p399_p3), 1041408   ;;  %p457_p5 = scmp.lt.s32.totalorder (!%p399_p3), %s2551_s22, 1  ;;  %p459_p6 = scmp.lt.s32.totalorder (!%p399_p3), %s2547_s21, 1  ;;  %v2565_v2 = vmov (!%p399_p3), 0  }
   0x9   : > { %s3321_s27 = smov (%p36_p4, %s3319_s27), 0  ;;  %402 = sbr.rel (%p399_p3) target bundleno = 650 (0x28a), region = 68 }
   0xa   : > { %2398 = vmatprep.subr.msk.bf16.mxu0 (!%p399_p3), %vm624_vm0, %v512_v0  ;;  %2399 = vmatprep.subr.msk.bf16.mxu1 (!%p399_p3), %vm624_vm0, %v512_v0  ;;  %v626_v1 = vsel (!%p399_p3), %vm624_vm0, %v512_v0, 0  ;;  %vm581_vm1 = vcmask (!%p399_p3), 31744   ;;  %vm1137_vm2 = vcmask (!%p399_p3), 1046528   ;;  %vm1184_vm3 = vcmask (!%p399_p3), 1045504  }
   0xb   : > { %2351 = vmatpush3.bf16.msra.mxu0 (!%p399_p3), %v626_v1  ;;  %2397 = vmatpush3.bf16.msra.mxu1 (!%p399_p3), %v626_v1  ;;  %vm1209_vm4 = vcmask (!%p399_p3), 1044480   ;;  %vm1256_vm5 = vcmask (!%p399_p3), 1043456   ;;  %vm1281_vm6 = vcmask (!%p399_p3), 1042432   ;;  %vm1460_vm7 = vcmask (!%p399_p3), 31750  }
   0xc   : > { %2455 = vset.pattern.permute.xlu1 (!%p399_p3), %v2565_v2  ;;  %2444 = vset.pattern.permute.xlu0 (!%p399_p3), %v2565_v2  ;;  %vm1462_vm8 = vcmask (!%p399_p3), 29696   ;;  %vm1761_vm9 = vcmask (!%p399_p3), 31746   ;;  %vm1763_vm10 = vcmask (!%p399_p3), 25600   ;;  %vm1607_vm11 = vcmask (!%p399_p3), 31748  }
   0xd   : > { %vm1609_vm12 = vcmask (!%p399_p3), 27648   ;;  %vm2078_vm13 = vcmask (!%p399_p3), 64544  }
  0x10   : > { %s3323_s22 = smov (!%p457_p5, %s2551_s22), 1  ;;  %s3325_s21 = smov (!%p459_p6, %s2547_s21), 1 }
  0x11   : > { %s2401_s30 = smul.u32 54, %s3323_s22 }
  0x12   : > { %s2400_s13 = smul.u32 27, %s3325_s21 }
  0x14   : > { %s463_s14 = sadd.s32 %s2401_s30, %s2400_s13  ;;  %s2206_s13 = sshll.u32 %s3325_s21, 2 }
  0x15   : > { %s2204_s15 = sshll.u32 %s463_s14, 2  ;;  %s2207_s14 = sshll.u32 %s3323_s22, 3 }
  0x16   : > { %s2674_s18 = scalar_lea.vmem %s3299_s0, %s2204_s15  ;;  %s2694_s28 = scalar_lea.vmem %s3300_s1, %s2204_s15 }
  0x17   : > { %v2511_v3 = vld [vmem:[%s2674_s18] sm:$0xff]   ;;  %v2512_v4 = vld [vmem:[%s2674_s18 + $0x50] sm:$0xff]   ;;  %v2513_v5 = vld [vmem:[%s2674_s18 + $0x8] sm:$0xff]   ;;  %s481_s17 = sadd.s32 %s2207_s14, %s2206_s13  ;;  %s2566_s15 = smov 4  }
  0x18   : > { %2352 = vmatprep.mubr.msk.bf16.mxu0 %vm581_vm1, %v2511_v3  ;;  %2372 = vmatprep.mubr.msk.bf16.mxu1 %vm581_vm1, %v2512_v4  ;;  %v2514_v6 = vld [vmem:[%s2674_s18 + $0x58] sm:$0xff]   ;;  %v2515_v7 = vld [vmem:[%s2674_s18 + $0x10] sm:$0xff]   ;;  %v2516_v8 = vld [vmem:[%s2674_s18 + $0x60] sm:$0xff]  }
  0x19   : > { %2353 = vmatmul.mubr.msk.bf16.vlgmr.msra.gmra.mrb[0].mxu0 %vm581_vm1, %v2513_v5  ;;  %2373 = vmatmul.mubr.msk.bf16.vlgmr.msra.gmra.mrb[0].mxu1 %vm581_vm1, %v2514_v6  ;;  %v2517_v9 = vld [vmem:[%s2674_s18 + $0x18] sm:$0xff]   ;;  %v2518_v10 = vld [vmem:[%s2674_s18 + $0x68] ss:$0 sps:$4 sm:$0xff]   ;;  %v2519_v11 = vld [vmem:[%s2674_s18 + $0x20] sm:$0xff]  }
  0x1a   : > { %2356 = vmatprep.mubr.msk.bf16.mxu0 %vm581_vm1, %v2515_v7  ;;  %2376 = vmatprep.mubr.msk.bf16.mxu1 %vm581_vm1, %v2516_v8  ;;  %v2315_v12 = vld [vmem:[%s2694_s28 + $0x18] sm:$0xff]   ;;  %v2316_v14 = vld [vmem:[%s2694_s28 + $0x20] sm:$0xff]   ;;  %v2313_v16 = vld [vmem:[%s2694_s28 + $0x8] sm:$0xff]   ;;  %v1112_v7 = vlaneseq }
  0x1b   : > { %v2276_v13 = vunpack.c.h.bf16 %v2315_v12  ;;  %v2262_v15 = vld [vmem:[%s2694_s28] sm:$0xff]   ;;  %v2279_v17 = vunpack.c.l.bf16 %v2316_v14  ;;  %v2275_v18 = vunpack.c.l.bf16 %v2315_v12  ;;  %v2318_v21 = vld [vmem:[%s2694_s28 + $0x30] sm:$0xff]   ;;  %v2520_v23 = vld [vmem:[%s2674_s18 + $0x28] sm:$0xff]   ;;  %v2268_v24 = vunpack.c.h.bf16 %v2313_v16 }
  0x1c   : > { %v2263_v19 = vunpack.c.l.bf16 %v2262_v15  ;;  %v2264_v20 = vunpack.c.h.bf16 %v2262_v15  ;;  %v2322_v22 = vld [vmem:[%s2694_s28 + $0x50] sm:$0xff]   ;;  %v2288_v25 = vunpack.c.h.bf16 %v2318_v21  ;;  %v2267_v26 = vunpack.c.l.bf16 %v2313_v16  ;;  %v2319_v27 = vld [vmem:[%s2694_s28 + $0x38] sm:$0xff]   ;;  %v2317_v38 = vld [vmem:[%s2694_s28 + $0x28] sm:$0xff]  }
  0x1d   : > { %v2521_v28 = vld [vmem:[%s2674_s18 + $0x30] sm:$0xff]   ;;  %v2456_v29 = vpack.i.bf16 %v2279_v17, %v2276_v13  ;;  %v2280_v31 = vunpack.c.h.bf16 %v2316_v14  ;;  %v2303_v32 = vunpack.c.l.bf16 %v2322_v22  ;;  %v2291_v35 = vunpack.c.l.bf16 %v2319_v27  ;;  %v2323_v39 = vld [vmem:[%s2694_s28 + $0x58] sm:$0xff]   ;;  %v2320_v47 = vld [vmem:[%s2694_s28 + $0x40] sm:$0xff]  }
  0x1e   : > { %v2445_v30 = vpack.i.bf16 %v2264_v20, %v2263_v19  ;;  %v2461_v33 = vpack.i.bf16 %v2288_v25, %v2268_v24  ;;  %v2450_v34 = vpack.i.bf16 %v2275_v18, %v2267_v26  ;;  %v2292_v36 = vunpack.c.h.bf16 %v2319_v27  ;;  %v2314_v37 = vld [vmem:[%s2694_s28 + $0x10] sm:$0xff]   ;;  %v2522_v46 = vld [vmem:[%s2674_s18 + $0x38] sm:$0xff]   ;;  %v2523_v48 = vld [vmem:[%s2674_s18 + $0x40] sm:$0xff]  }
  0x1f   : > { %2457 = vperm.xlu1 %2455, %v2456_v29   ;;  %v2471_v40 = vpack.i.bf16 %v2303_v32, %v2280_v31  ;;  %v2271_v41 = vunpack.c.l.bf16 %v2314_v37  ;;  %v2283_v43 = vunpack.c.l.bf16 %v2317_v38  ;;  %v2304_v44 = vunpack.c.h.bf16 %v2322_v22  ;;  %v2321_v55 = vld [vmem:[%s2694_s28 + $0x48] sm:$0xff]   ;;  %v2324_v56 = vld [vmem:[%s2694_s28 + $0x60] sm:$0xff]   ;;  %v2745_v22 = vld [vmem:[%s2674_s18 + $0x1c] sm:$0x8] }
  0x20   : > { %2446 = vperm.xlu0 %2444, %v2445_v30   ;;  %v2466_v42 = vpack.i.bf16 %v2292_v36, %v2291_v35  ;;  %v2307_v45 = vunpack.c.l.bf16 %v2323_v39  ;;  %v2272_v49 = vunpack.c.h.bf16 %v2314_v37  ;;  %v2308_v50 = vunpack.c.h.bf16 %v2323_v39  ;;  %v2524_v63 = vld [vmem:[%s2674_s18 + $0x48] sm:$0xff]   ;;  %v1110_v15 = vld [vmem:[%s2674_s18] sm:$0xff]   ;;  %v1198_v39 = vld [vmem:[%s2674_s18 + $0x10] sm:$0x3] }
  0x21   : > { %2357 = vmatmul.mubr.msk.bf16.gmra.mrb[4].mxu0 %vm581_vm1, %v2517_v9  ;;  %2377 = vmatmul.mubr.msk.bf16.gmra.mrb[4].mxu1 %vm581_vm1, %v2518_v10  ;;  %v2481_v51 = vpack.i.bf16 %v2283_v43, %v2271_v41  ;;  %v2284_v53 = vunpack.c.h.bf16 %v2317_v38  ;;  %v2295_v54 = vunpack.c.l.bf16 %v2320_v47  ;;  %v2299_v57 = vunpack.c.l.bf16 %v2321_v55  ;;  %v889_v4 = vld [vmem:[%s2694_s28 + $0x68] sm:$0xf]  ;;  %v1106_v10 = vld [vmem:[%s3301_s2] sm:$0xff]  ;;  %v1197_v38 = vld [vmem:[%s2674_s18 + $0xc] sm:$0xe]  ;;  %s2208_s28 = sshll.u32 %s481_s17, 3 }
  0x22   : > { %2360 = vmatprep.mubr.msk.bf16.mxu0 %vm581_vm1, %v2519_v11  ;;  %v2476_v52 = vpack.i.bf16 %v2307_v45, %v2304_v44  ;;  %v2311_v58 = vunpack.c.l.bf16 %v2324_v56  ;;  %v2491_v59 = vpack.i.bf16 %v2272_v49, %v2308_v50  ;;  %v2287_v61 = vunpack.c.l.bf16 %v2318_v21  ;;  %v1126_v16 = vld [vmem:[%s2674_s18 + $0x8] sm:$0x1]  ;;  %v1172_v29 = vld [vmem:[%s2674_s18 + $0x8] sm:$0xe]  ;;  %v2778_v49 = vld [vmem:[%s2674_s18 + $0x20] sm:$0xff]   ;;  %s3264_s21 = scalar_lea.vmem %s3311_s12, %s2208_s28 }
  0x23   : > { %2462 = vperm.xlu1 %2455, %v2461_v33   ;;  %v2486_v60 = vpack.i.bf16 %v2295_v54, %v2284_v53  ;;  %v2296_v62 = vunpack.c.h.bf16 %v2320_v47  ;;  %v2300_v2 = vunpack.c.h.bf16 %v2321_v55  ;;  %v2312_v3 = vunpack.c.h.bf16 %v2324_v56  ;;  %v1173_v33 = vld [vmem:[%s2674_s18 + $0xc] sm:$0x1] }
  0x24   : > { %2451 = vperm.xlu0 %2444, %v2450_v34   ;;  %v2501_v0 = vpack.i.bf16 %v2299_v57, %v2311_v58  ;;  %v916_v6 = vunpack.c.l.bf16 %v889_v4  ;;  %v2723_v8 = vshrl.u32 %v1112_v7, 7  ;;  %v1127_v18 = vunpack.c.h.bf16 %v1110_v15  ;;  %v1270_v7 = vld [vmem:[%s2674_s18 + $0x18] sm:$0x7] }
  0x25   : > { %v2496_v1 = vpack.i.bf16 %v2287_v61, %v2296_v62  ;;  %v2506_v5 = vpack.i.bf16 %v2300_v2, %v2312_v3  ;;  %v1128_v19 = vunpack.c.l.bf16 %v1126_v16  ;;  %v1111_v24 = vunpack.c.l.bf16 %v1110_v15  ;;  %v1245_v61 = vld [vmem:[%s2674_s18 + $0x14] sm:$0x3]  ;;  %v1269_v2 = vld [vmem:[%s2674_s18 + $0x14] sm:$0xc] }
  0x26   : > { %v1131_v9 = vsub.s32 1, %v2723_v8  ;;  %v1114_v11 = vsub.s32 0, %v2723_v8  ;;  %v1154_v13 = vsub.s32 2, %v2723_v8  ;;  %v1178_v14 = vsub.s32 3, %v2723_v8 }
  0x27   : > { %2472 = vperm.xlu1 %2455, %v2471_v40   ;;  %v1203_v17 = vsub.s32 4, %v2723_v8  ;;  %v1226_v21 = vsub.s32 5, %v2723_v8  ;;  %v1331_v34 = vunpack.c.l.bf16 %v2745_v22  ;;  %v1250_v36 = vsub.s32 6, %v2723_v8 }
  0x28   : > { %2467 = vperm.xlu0 %2444, %v2466_v42   ;;  %v2732_v12 = vrot.slane %v1106_v10, %v1131_v9  ;;  %v2741_v20 = vrot.slane %v1106_v10, %v1114_v11  ;;  %v2755_v27 = vrot.slane %v1106_v10, %v1178_v14  ;;  %v1174_v43 = vunpack.c.l.bf16 %v1172_v29 }
  0x29   : > { %2361 = vmatmul.mubr.msk.bf16.gmra.mrb[8].mxu0 %vm581_vm1, %v2520_v23  ;;  %v2749_v23 = vrot.slane %v1106_v10, %v1154_v13  ;;  %v2761_v30 = vrot.slane %v1106_v10, %v1203_v17  ;;  %v2767_v35 = vrot.slane %v1106_v10, %v1226_v21  ;;  %v1275_v44 = vsub.s32 7, %v2723_v8  ;;  %v3067_v8 = vld [vmem:[%s3306_s7 + $0x1] ss:$0 sm:$0xff] }
  0x2a   : > { %2364 = vmatprep.mubr.msk.bf16.mxu0 %vm581_vm1, %v2521_v28  ;;  %v1133_v25 = vmul.f32 %v2732_v12, %v1127_v18  ;;  %v1134_v26 = vmul.f32 %v2732_v12, %v1128_v19  ;;  %v1150_v28 = vld [vmem:[%s2674_s18 + $0x4] sm:$0x1]  ;;  %v1116_v37 = vmul.f32 %v2741_v20, %v1111_v24  ;;  %v1199_v47 = vunpack.c.l.bf16 %v1197_v38 }
  0x2b   : > { %2482 = vperm.xlu1 %2455, %v2481_v51   ;;  %v1151_v41 = vunpack.c.l.bf16 %v1150_v28  ;;  %v1156_v42 = vmul.f32 %v2749_v23, %v1111_v24  ;;  %v1200_v53 = vunpack.c.l.bf16 %v1198_v39  ;;  %v1332_v62 = vunpack.c.l.bf16 %v2778_v49  ;;  %v1294_v24 = vld [vmem:[%s2674_s18 + $0x14] sm:$0x7] }
  0x2c   : > { %2477 = vperm.xlu0 %2444, %v2476_v52   ;;  %v1138_v31 = vrot.slane %v1133_v25, 1  ;;  %v1139_v32 = vrot.slane %v1134_v26, 1  ;;  %v1180_v52 = vmul.f32 %v2755_v27, %v1174_v43  ;;  %v1205_v55 = vmul.f32 %v2761_v30, %v1199_v47 }
  0x2d   : > { %v1157_v50 = vmul.f32 %v2749_v23, %v1151_v41  ;;  %v1160_v51 = vrot.slane %v1156_v42, 1  ;;  %v2792_v3 = vrot.slane %v1106_v10, %v1250_v36  ;;  %v2796_v4 = vrot.slane %v1106_v10, %v1275_v44  ;;  %v2807_v10 = vld [vmem:[%s3301_s2 + $0x8] ss:$0 sm:$0xff]  ;;  %v1318_v41 = vld [vmem:[%s2674_s18 + $0x18] sm:$0x8] }
  0x2e   : > { %v1140_v40 = vsel %vm1137_vm2, %v1138_v31, %v1139_v32  ;;  %v1185_v58 = vrot.slane %v1180_v52, 2  ;;  %v1247_v28 = vunpack.c.l.bf16 %v1245_v61  ;;  %v1271_v29 = vunpack.c.l.bf16 %v1269_v2  ;;  %v1375_v2 = vld [vmem:[%s2674_s18 + $0x2c] sm:$0x1] }
  0x2f   : > { %2492 = vperm.xlu1 %2455, %v2491_v59   ;;  %v1142_v45 = vadd.f32 %v1140_v40, %v1116_v37  ;;  %v1161_v57 = vrot.slane %v1157_v50, 1  ;;  %v1206_v59 = vmul.f32 %v2761_v30, %v1200_v53  ;;  %v1295_v40 = vunpack.c.l.bf16 %v1294_v24 }
  0x30   : > { %2487 = vperm.xlu0 %2444, %v2486_v60   ;;  %v1244_v60 = vld [vmem:[%s2674_s18 + $0x10] sm:$0xc]  ;;  %v1253_v38 = vmul.f32 %v2792_v3, %v1247_v28  ;;  %v1277_v39 = vmul.f32 %v2796_v4, %v1271_v29  ;;  %v1377_v28 = vunpack.c.l.bf16 %v1375_v2 }
  0x31   : > { %2365 = vmatmul.mubr.msk.bf16.gmra.mrb[12].mxu0 %vm581_vm1, %v2522_v46  ;;  %v1175_v46 = vunpack.c.l.bf16 %v1173_v33  ;;  %v1246_v26 = vunpack.c.l.bf16 %v1244_v60  ;;  %v1272_v33 = vunpack.c.l.bf16 %v1270_v7  ;;  %v1333_v60 = vmul.f32 %v1331_v34, %v2732_v12 }
  0x32   : > { %2368 = vmatprep.mubr.msk.bf16.mxu0 %vm581_vm1, %v2523_v48  ;;  %v1222_v48 = vld [vmem:[%s2674_s18 + $0xc] sm:$0x3]  ;;  %v1282_v50 = vrot.slane %v1277_v39, 5  ;;  %v1364_v34 = vunpack.c.h.bf16 %v2778_v49 }
  0x33   : > { %2502 = vperm.xlu1 %2455, %v2501_v0   ;;  %v1181_v54 = vmul.f32 %v2755_v27, %v1175_v46  ;;  %v1223_v56 = vunpack.c.l.bf16 %v1222_v48  ;;  %v1210_v0 = vrot.slane %v1205_v55, 3  ;;  %v1252_v37 = vmul.f32 %v2792_v3, %v1246_v26  ;;  %v1319_v46 = vld [vmem:[%s2674_s18 + $0x1c] sm:$0x7]  ;;  %v1408_v49 = vld [vmem:[%s2674_s18 + $0x2c] sm:$0xe] }
  0x34   : > { %2497 = vperm.xlu0 %2444, %v2496_v1   ;;  %v1228_v1 = vmul.f32 %v2767_v35, %v1174_v43  ;;  %v1258_v48 = vrot.slane %v1253_v38, 4  ;;  %v1320_v55 = vunpack.c.l.bf16 %v1318_v41  ;;  %v1337_v7 = vrot.slane %v1333_v60, 1 }
  0x35   : > { %v1229_v18 = vmul.f32 %v2767_v35, %v1223_v56  ;;  %v1257_v47 = vrot.slane %v1252_v37, 4  ;;  %v1347_v56 = vld [vmem:[%s2674_s18 + $0x1c] ss:$12 sps:$4 sm:$0xff]  }
  0x36   : > { %v1232_v19 = vrot.slane %v1228_v1, 3  ;;  %v1322_v1 = vmul.f32 %v1320_v55, %v2741_v20  ;;  %v1349_v22 = vmul.f32 %v1320_v55, %v2749_v23 }
  0x37   : > { %1049 = vperm.xlu1 %2455, %v916_v6   ;;  %v1211_v6 = vrot.slane %v1206_v59, 3  ;;  %v1233_v32 = vrot.slane %v1229_v18, 3  ;;  %v1321_v59 = vunpack.c.l.bf16 %v1319_v46  ;;  %v1426_v46 = vld [vmem:[%s2674_s18 + $0x30] sm:$0xe] }
  0x38   : > { %2507 = vperm.xlu0 %2444, %v2506_v5   ;;  %v1162_v5 = vsel %vm1137_vm2, %v1160_v51, %v1161_v57  ;;  %v1300_v51 = vmul.f32 %v2807_v10, %v1246_v26  ;;  %v1259_v57 = vsel %vm1256_vm5, %v1257_v47, %v1258_v48  ;;  %v1376_v26 = vunpack.c.h.bf16 %v1347_v56 }
  0x39   : > { %2369 = vmatmul.mubr.msk.bf16.gmra.mrb[16].mxu0 %vm581_vm1, %v2524_v63  ;;  %v1186_v63 = vrot.slane %v1181_v54, 2  ;;  %v1164_v15 = vadd.f32 %v1162_v5, %v1142_v45  ;;  %v1212_v25 = vsel %vm1209_vm4, %v1210_v0, %v1211_v6  ;;  %v1234_v43 = vsel %vm1209_vm4, %v1232_v19, %v1233_v32 }
  0x3a   : > { %v1278_v45 = vmul.f32 %v2796_v4, %v1272_v33  ;;  %v1301_v54 = vmul.f32 %v2807_v10, %v1295_v40  ;;  %v1323_v5 = vmul.f32 %v1321_v59, %v2741_v20  ;;  %v1334_v6 = vmul.f32 %v1332_v62, %v2732_v12 }
  0x3b   : > { %v1187_v16 = vsel %vm1184_vm3, %v1185_v58, %v1186_v63  ;;  %v1304_v58 = vrot.slane %v1300_v51, 5  ;;  %v1353_v62 = vrot.slane %v1349_v22, 1  ;;  %v1378_v39 = vmul.f32 %v1376_v26, %v2761_v30 }
  0x3c   : > { %v1189_v31 = vadd.f32 %v1187_v16, %v1164_v15  ;;  %v1283_v53 = vrot.slane %v1278_v45, 5  ;;  %v1305_v0 = vrot.slane %v1301_v54, 5  ;;  %v1348_v15 = vunpack.c.l.bf16 %v1347_v56  ;;  %v1392_v16 = vld [vmem:[%s2674_s18 + $0x28] sm:$0x1]  ;;  %v1409_v45 = vld [vmem:[%s2674_s18 + $0x30] sm:$0x1] }
  0x3d   : > { %v1338_v24 = vrot.slane %v1334_v6, 1  ;;  %v1393_v32 = vunpack.c.l.bf16 %v1392_v16  ;;  %v1410_v56 = vunpack.c.l.bf16 %v1408_v49  ;;  %v1411_v59 = vunpack.c.l.bf16 %v1409_v45  ;;  %v1494_v49 = vld [vmem:[%s2674_s18 + $0x38] sm:$0x7] }
  0x3e   : > { %v1214_v42 = vadd.f32 %v1212_v25, %v1189_v31  ;;  %v1284_v63 = vsel %vm1281_vm6, %v1282_v50, %v1283_v53  ;;  %v1306_v19 = vsel %vm1281_vm6, %v1304_v58, %v1305_v0  ;;  %v1350_v25 = vmul.f32 %v1348_v15, %v2749_v23 }
  0x3f   : > { %v1365_v31 = vmul.f32 %v1364_v34, %v2755_v27  ;;  %v1339_v33 = vsel %vm1137_vm2, %v1337_v7, %v1338_v24  ;;  %v1343_v37 = vadd.f32 %v1338_v24, %v1323_v5  ;;  %v1382_v50 = vrot.slane %v1378_v39, 3 }
  0x40   : > { %v1236_v52 = vadd.f32 %v1234_v43, %v1214_v42  ;;  %v1354_v38 = vrot.slane %v1350_v25, 1  ;;  %v1342_v40 = vadd.f32 %v1339_v33, %v1322_v1  ;;  %v1379_v42 = vmul.f32 %v1377_v28, %v2761_v30  ;;  %v1477_v33 = vld [vmem:[%s2674_s18 + $0x3c] sm:$0x7] }
  0x41   : > { %v1367_v41 = vrot.slane %v1365_v31, 2  ;;  %v1394_v43 = vmul.f32 %v1364_v34, %v2767_v35  ;;  %v1395_v51 = vmul.f32 %v1393_v32, %v2767_v35  ;;  %v1428_v60 = vunpack.c.l.bf16 %v1426_v46  ;;  %v1465_v34 = vld [vmem:[%s2674_s18 + $0x34] sm:$0xc]  ;;  %v1476_v32 = vld [vmem:[%s2674_s18 + $0x38] sm:$0xc] }
  0x42   : > { %v1261_v61 = vadd.f32 %v1259_v57, %v1236_v52  ;;  %v1355_v47 = vsel %vm1137_vm2, %v1353_v62, %v1354_v38  ;;  %v1359_v48 = vadd.f32 %v1354_v38, %v1343_v37  ;;  %v1427_v52 = vld [vmem:[%s2674_s18 + $0x34] sm:$0x3]  ;;  %v1383_v54 = vrot.slane %v1379_v42, 3 }
  0x43   : > { %v1358_v53 = vadd.f32 %v1355_v47, %v1342_v40  ;;  %v1398_v55 = vrot.slane %v1394_v43, 3  ;;  %v1399_v58 = vrot.slane %v1395_v51, 3  ;;  %v1412_v1 = vmul.f32 %v1410_v56, %v2792_v3  ;;  %v1510_v47 = vld [vmem:[%s2674_s18 + $0x3c] sm:$0x8] }
  0x44   : > { %v1286_v18 = vadd.f32 %v1284_v63, %v1261_v61  ;;  %v1370_v57 = vadd.f32 %v1367_v41, %v1359_v48  ;;  %v1444_v61 = vld [vmem:[%s2674_s18 + $0x30] sm:$0x3]  ;;  %v1384_v0 = vsel %vm1209_vm4, %v1382_v50, %v1383_v54  ;;  %v1429_v2 = vunpack.c.l.bf16 %v1427_v52 }
  0x45   : > { %v1369_v63 = vadd.f32 %v1367_v41, %v1358_v53  ;;  %v1400_v6 = vsel %vm1209_vm4, %v1398_v55, %v1399_v58  ;;  %v1413_v7 = vmul.f32 %v1411_v59, %v2792_v3  ;;  %v1430_v15 = vmul.f32 %v1428_v60, %v2796_v4  ;;  %v1511_v53 = vld [vmem:[%s2674_s18 + $0x40] sm:$0x7]  ;;  %v1528_v58 = vld [vmem:[%s2674_s18 + $0x40] sm:$0x8]  ;;  %v2869_v59 = vld [vmem:[%s2674_s18 + $0x44] sm:$0xff]  }
  0x46   : > { %v1308_v29 = vadd.f32 %v1306_v19, %v1286_v18  ;;  %v1388_v5 = vadd.f32 %v1384_v0, %v1370_v57  ;;  %v1416_v18 = vrot.slane %v1412_v1, 4  ;;  %v1431_v19 = vmul.f32 %v1429_v2, %v2796_v4 }
  0x47   : > { %v1387_v16 = vadd.f32 %v1382_v50, %v1369_v63  ;;  %v1445_v22 = vunpack.c.l.bf16 %v1444_v61  ;;  %v1417_v25 = vrot.slane %v1413_v7, 4  ;;  %v1434_v26 = vrot.slane %v1430_v15, 5  ;;  %v1466_v63 = vld [vmem:[%s2674_s18 + $0x38] sm:$0x3]  ;;  %v2874_v15 = vld [vmem:[%s2674_s18 + $0x40] ss:$12 sps:$4 sm:$0xff]  }
  0x48   : > { %1316 = vst.msk [vmem:[#allocation3] sm:$0xff] %vm581_vm1, %v1308_v29  ;;  %v1404_v24 = vadd.f32 %v1400_v6, %v1388_v5  ;;  %v1446_v28 = vmul.f32 %v2807_v10, %v1410_v56  ;;  %v1435_v62 = vrot.slane %v1431_v19, 5  ;;  %v1467_v39 = vunpack.c.l.bf16 %v1465_v34 }
  0x49   : > { %v1403_v29 = vadd.f32 %v1398_v55, %v1387_v16  ;;  %v1447_v31 = vmul.f32 %v2807_v10, %v1445_v22  ;;  %v1418_v37 = vsel %vm1256_vm5, %v1416_v18, %v1417_v25  ;;  %v1478_v45 = vunpack.c.l.bf16 %v1476_v32 }
  0x4a   : > { %v1450_v38 = vrot.slane %v1446_v28, 5  ;;  %v1422_v41 = vadd.f32 %v1418_v37, %v1404_v24  ;;  %v1436_v42 = vsel %vm1281_vm6, %v1434_v26, %v1435_v62  ;;  %v1479_v46 = vunpack.c.l.bf16 %v1477_v33 }
  0x4b   : > { %v1421_v40 = vadd.f32 %v1416_v18, %v1403_v29  ;;  %v1451_v43 = vrot.slane %v1447_v31, 5  ;;  %v1495_v52 = vunpack.c.l.bf16 %v1494_v49  ;;  %v1469_v54 = vmul.f32 %v1467_v39, %v2741_v20 }
  0x4c   : > { %v1440_v50 = vadd.f32 %v1436_v42, %v1422_v41  ;;  %v1480_v55 = vmul.f32 %v1478_v45, %v2732_v12  ;;  %v1481_v56 = vmul.f32 %v1479_v46, %v2732_v12  ;;  %v1496_v57 = vmul.f32 %v1467_v39, %v2749_v23  ;;  %v1613_v46 = vld [vmem:[%s2674_s18 + $0x54] sm:$0x1] }
  0x4d   : > { %v1439_v48 = vadd.f32 %v1434_v26, %v1421_v40  ;;  %v1452_v51 = vsel %vm1281_vm6, %v1450_v38, %v1451_v43  ;;  %v1497_v0 = vmul.f32 %v1495_v52, %v2749_v23  ;;  %v1512_v1 = vunpack.c.l.bf16 %v1510_v47  ;;  %v1612_v43 = vld [vmem:[%s2674_s18 + $0x50] sm:$0xe]  ;;  %v1623_v47 = vld [vmem:[%s2674_s18 + $0x54] sm:$0xe] }
  0x4e   : > { %v1456_v61 = vadd.f32 %v1452_v51, %v1440_v50  ;;  %v1484_v2 = vrot.slane %v1480_v55, 1  ;;  %v1485_v5 = vrot.slane %v1481_v56, 1  ;;  %v1500_v6 = vrot.slane %v1496_v57, 1 }
  0x4f   : > { %v1455_v60 = vadd.f32 %v1450_v38, %v1439_v48  ;;  %v1513_v7 = vunpack.c.l.bf16 %v1511_v53  ;;  %v1501_v16 = vrot.slane %v1497_v0, 1  ;;  %v1514_v18 = vmul.f32 %v1512_v1, %v2755_v27  ;;  %v1624_v53 = vld [vmem:[%s2674_s18 + $0x58] sm:$0x3]  ;;  %v1657_v0 = vld [vmem:[%s2674_s18 + $0x58] sm:$0xc] }
  0x50   : > { %1463 = vst.msk [vmem:[#allocation3 + $0xa] sm:$0x3f] %vm1462_vm8, %v1456_v61  ;;  %v1530_v19 = vunpack.c.l.bf16 %v1528_v58  ;;  %v1531_v22 = vunpack.c.l.bf16 %v2869_v59  ;;  %v1468_v34 = vunpack.c.l.bf16 %v1466_v63  ;;  %v1486_v24 = vsel %vm1137_vm2, %v1484_v2, %v1485_v5 }
  0x51   : > { %1461 = vst.msk [vmem:[#allocation3 + $0x2] sm:$0xc0] %vm1460_vm7, %v1455_v60  ;;  %v1515_v25 = vmul.f32 %v1513_v7, %v2755_v27  ;;  %v1547_v26 = vunpack.c.l.bf16 %v2874_v15  ;;  %v1489_v28 = vadd.f32 %v1486_v24, %v1469_v54  ;;  %v1502_v29 = vsel %vm1137_vm2, %v1500_v6, %v1501_v16  ;;  %v1641_v54 = vld [vmem:[%s2674_s18 + $0x54] sm:$0x3] }
  0x52   : > { %v1518_v62 = vrot.slane %v1514_v18, 2  ;;  %v1532_v32 = vmul.f32 %v1530_v19, %v2761_v30  ;;  %v2886_v33 = vmul.f32 %v1531_v22, %v2761_v30  ;;  %v1470_v37 = vmul.f32 %v1468_v34, %v2741_v20  ;;  %v1675_v18 = vld [vmem:[%s2674_s18 + $0x5c] sm:$0xc] }
  0x53   : > { %v1519_v31 = vrot.slane %v1515_v25, 2  ;;  %v1505_v38 = vadd.f32 %v1502_v29, %v1489_v28  ;;  %v1548_v39 = vmul.f32 %v1512_v1, %v2767_v35  ;;  %v2891_v49 = vmul.f32 %v1547_v26, %v2767_v35  ;;  %v1658_v1 = vld [vmem:[%s2674_s18 + $0x5c] sm:$0x3] }
  0x54   : > { %v1536_v41 = vrot.slane %v1532_v32, 3  ;;  %v1537_v42 = vrot.slane %v2886_v33, 3  ;;  %v1490_v45 = vadd.f32 %v1485_v5, %v1470_v37  ;;  %v1563_v52 = vunpack.c.h.bf16 %v2869_v59  ;;  %v1676_v32 = vld [vmem:[%s2674_s18 + $0x60] sm:$0x7] }
  0x55   : > { %v1520_v40 = vsel %vm1184_vm3, %v1518_v62, %v1519_v31  ;;  %v1552_v50 = vrot.slane %v1548_v39, 3  ;;  %v1553_v51 = vrot.slane %v2891_v49, 3  ;;  %v1614_v56 = vunpack.c.l.bf16 %v1612_v43  ;;  %v1693_v39 = vld [vmem:[%s2674_s18 + $0x5c] sm:$0x7] }
  0x56   : > { %v1523_v48 = vadd.f32 %v1520_v40, %v1505_v38  ;;  %v1538_v55 = vsel %vm1209_vm4, %v1536_v41, %v1537_v42  ;;  %v1615_v57 = vunpack.c.l.bf16 %v1613_v46  ;;  %v1625_v58 = vunpack.c.l.bf16 %v1623_v47 }
  0x57   : > { %v1506_v60 = vadd.f32 %v1501_v16, %v1490_v45  ;;  %v1626_v61 = vunpack.c.l.bf16 %v1624_v53  ;;  %v1642_v63 = vunpack.c.l.bf16 %v1641_v54  ;;  %v1554_v5 = vsel %vm1209_vm4, %v1552_v50, %v1553_v51  ;;  %v1709_v54 = vld [vmem:[%s2674_s18 + $0x60] sm:$0x8] }
  0x58   : > { %v1541_v2 = vadd.f32 %v1538_v55, %v1523_v48  ;;  %v2911_v6 = vmul.f32 %v1563_v52, %v2792_v3  ;;  %v1575_v7 = vunpack.c.h.bf16 %v2874_v15  ;;  %v1616_v16 = vmul.f32 %v1614_v56, %v2741_v20 }
  0x59   : > { %v1617_v19 = vmul.f32 %v1615_v57, %v2741_v20  ;;  %v1627_v22 = vmul.f32 %v1625_v58, %v2732_v12  ;;  %v1628_v34 = vmul.f32 %v1626_v61, %v2732_v12  ;;  %v1643_v24 = vmul.f32 %v1614_v56, %v2749_v23  ;;  %v1710_v58 = vld [vmem:[%s2674_s18 + $0x64] sm:$0x7] }
  0x5a   : > { %v1644_v25 = vmul.f32 %v1642_v63, %v2749_v23  ;;  %v1659_v26 = vunpack.c.l.bf16 %v1657_v0  ;;  %v1660_v28 = vunpack.c.l.bf16 %v1658_v1  ;;  %v1677_v15 = vunpack.c.l.bf16 %v1675_v18 }
  0x5b   : > { %v1631_v29 = vrot.slane %v1627_v22, 1  ;;  %v1632_v62 = vrot.slane %v1628_v34, 1  ;;  %v1524_v33 = vadd.f32 %v1519_v31, %v1506_v60  ;;  %v1557_v37 = vadd.f32 %v1554_v5, %v1541_v2  ;;  %v1728_v22 = vld [vmem:[%s2674_s18 + $0x64] sm:$0xff]  }
  0x5c   : > { %v1566_v38 = vrot.slane %v2911_v6, 4  ;;  %v2924_v20 = vmul.f32 %v1575_v7, %v2796_v4  ;;  %v1647_v23 = vrot.slane %v1643_v24, 1  ;;  %v1648_v41 = vrot.slane %v1644_v25, 1 }
  0x5d   : > { %v1633_v12 = vsel %vm1137_vm2, %v1631_v29, %v1632_v62  ;;  %v1637_v40 = vadd.f32 %v1632_v62, %v1617_v19  ;;  %v1661_v45 = vmul.f32 %v1659_v26, %v2755_v27  ;;  %v1662_v46 = vmul.f32 %v1660_v28, %v2755_v27  ;;  %v1727_v19 = vld [vmem:[%s2674_s18 + $0x64] sm:$0x8] }
  0x5e   : > { %v1636_v43 = vadd.f32 %v1633_v12, %v1616_v16  ;;  %v1678_v31 = vunpack.c.l.bf16 %v1676_v32  ;;  %v1649_v47 = vsel %vm1137_vm2, %v1647_v23, %v1648_v41  ;;  %v1679_v50 = vmul.f32 %v1677_v15, %v2761_v30 }
  0x5f   : > { %v1653_v48 = vadd.f32 %v1648_v41, %v1637_v40  ;;  %v1694_v53 = vunpack.c.l.bf16 %v1693_v39  ;;  %v1542_v55 = vadd.f32 %v1537_v42, %v1524_v33  ;;  %v1568_v56 = vadd.f32 %v1566_v38, %v1557_v37 }
  0x60   : > { %v1581_v57 = vrot.slane %v2924_v20, 5  ;;  %v1652_v60 = vadd.f32 %v1649_v47, %v1636_v43  ;;  %v1665_v61 = vrot.slane %v1661_v45, 2  ;;  %v1666_v27 = vrot.slane %v1662_v46, 2  ;;  %v1788_v43 = vld [vmem:[%s3303_s4] sm:$0x3]  ;;  %v1766_v46 = vld [vmem:[#allocation3] sm:$0xff] }
  0x61   : > { %v1680_v63 = vmul.f32 %v1678_v31, %v2761_v30  ;;  %v1683_v0 = vrot.slane %v1679_v50, 3  ;;  %v1695_v1 = vmul.f32 %v1659_v26, %v2767_v35  ;;  %v1696_v2 = vmul.f32 %v1694_v53, %v2767_v35  ;;  %v1767_v31 = vld [vmem:[#allocation3 + $0x8] sm:$0xff] }
  0x62   : > { %v1711_v5 = vunpack.c.l.bf16 %v1709_v54  ;;  %v1667_v42 = vsel %vm1184_vm3, %v1665_v61, %v1666_v27  ;;  %v1671_v7 = vadd.f32 %v1666_v27, %v1653_v48  ;;  %v1712_v16 = vunpack.c.l.bf16 %v1710_v58  ;;  %v2241_v47 = vld [vmem:[%s3302_s3] ss:$0 sm:$0xff] }
  0x63   : > { %v1684_v18 = vrot.slane %v1680_v63, 3  ;;  %v1558_v34 = vadd.f32 %v1553_v51, %v1542_v55  ;;  %v2947_v24 = vadd.f32 %v1581_v57, %v1568_v56  ;;  %v1670_v30 = vadd.f32 %v1667_v42, %v1652_v60  ;;  %v1574_v55 = vld [vmem:[%s2674_s18 + $0x50] sm:$0x1]  ;;  %v1591_v56 = vld [vmem:[%s2674_s18 + $0x4c] sm:$0x1] }
  0x64   : > { %v1699_v25 = vrot.slane %v1695_v1, 3  ;;  %v1700_v28 = vrot.slane %v1696_v2, 3  ;;  %v1713_v29 = vmul.f32 %v1711_v5, %v2792_v3  ;;  %v1714_v32 = vmul.f32 %v1712_v16, %v2792_v3  ;;  %v2242_v63 = vld [vmem:[%s3302_s3 + $0x1] ss:$0 sm:$0xff] }
  0x65   : > { %v1685_v26 = vsel %vm1209_vm4, %v1683_v0, %v1684_v18  ;;  %v1689_v35 = vadd.f32 %v1684_v18, %v1671_v7  ;;  %v1729_v15 = vunpack.c.l.bf16 %v1727_v19  ;;  %v1730_v33 = vunpack.c.h.bf16 %v1728_v22  ;;  %v1934_v19 = vld [vmem:[%s3309_s10] sm:$0x3] }
  0x66   : > { %v1688_v62 = vadd.f32 %v1685_v26, %v1670_v30  ;;  %v1701_v49 = vsel %vm1209_vm4, %v1699_v25, %v1700_v28  ;;  %v1717_v37 = vrot.slane %v1713_v29, 4  ;;  %v1746_v39 = vunpack.c.l.bf16 %v1728_v22 }
  0x67   : > { %v1705_v51 = vadd.f32 %v1700_v28, %v1689_v35  ;;  %v1718_v40 = vrot.slane %v1714_v32, 4  ;;  %v1731_v23 = vmul.f32 %v1729_v15, %v2796_v4  ;;  %v1732_v41 = vmul.f32 %v1730_v33, %v2796_v4 }
  0x68   : > { %v1704_v12 = vadd.f32 %v1701_v49, %v1688_v62  ;;  %v1747_v3 = vmul.f32 %v2807_v10, %v1711_v5  ;;  %v1748_v45 = vmul.f32 %v2807_v10, %v1746_v39  ;;  %v1789_v27 = vunpack.c.l.bf16 %v1788_v43 }
  0x69   : > { %v1719_v48 = vsel %vm1256_vm5, %v1717_v37, %v1718_v40  ;;  %v1723_v50 = vadd.f32 %v1718_v40, %v1705_v51  ;;  %v1735_v53 = vrot.slane %v1731_v23, 5  ;;  %v1736_v54 = vrot.slane %v1732_v41, 5 }
  0x6a   : > { %v1722_v58 = vadd.f32 %v1719_v48, %v1704_v12  ;;  %v1751_v60 = vrot.slane %v1747_v3, 5  ;;  %v1752_v61 = vrot.slane %v1748_v45, 5  ;;  %v1775_v2 = vmul.f32 %v2241_v47, %v1766_v46  ;;  %2380 = vmatprep.subr.msk.mxu1 %vm1256_vm5, %v1789_v27  ;;  %v1108_v3 = vld [vmem:[%s3307_s8] sm:$0xff] }
  0x6b   : > { %v1737_v0 = vsel %vm1281_vm6, %v1735_v53, %v1736_v54  ;;  %v1741_v1 = vadd.f32 %v1736_v54, %v1723_v50  ;;  %v1776_v5 = vmul.f32 %v2241_v47, %v1767_v31  ;;  %v1576_v18 = vunpack.c.l.bf16 %v1574_v55  ;;  %2381 = vmatpush3.msk.msra.mxu1 %vm1256_vm5, %v1789_v27 }
  0x6c   : > { %v1740_v42 = vadd.f32 %v1737_v0, %v1722_v58  ;;  %v1753_v7 = vsel %vm1281_vm6, %v1751_v60, %v1752_v61  ;;  %v1592_v16 = vunpack.c.l.bf16 %v1591_v56  ;;  %v1784_v30 = vadd.f32 %v2242_v63, %v1775_v2 }
  0x6d   : > { %v1757_v22 = vadd.f32 %v1752_v61, %v1741_v1  ;;  %v1785_v25 = vadd.f32 %v2242_v63, %v1776_v5  ;;  %v1593_v26 = vmul.f32 %v2807_v10, %v1563_v52  ;;  %v1578_v28 = vmul.f32 %v1576_v18, %v2796_v4 }
  0x6e   : > { %v1756_v35 = vadd.f32 %v1753_v7, %v1740_v42  ;;  %v1594_v29 = vmul.f32 %v2807_v10, %v1592_v16  ;;  %v1569_v62 = vadd.f32 %v1566_v38, %v1558_v34  ;;  %2382 = vmatprep.mubr.msk.f32.mxu1 %vm581_vm1, %v1784_v30  ;;  %v1935_v15 = vunpack.c.l.bf16 %v1934_v19 }
  0x6f   : > { %1764 = vst.msk [vmem:[#allocation3 + $0x1e] sm:$0x3] %vm1763_vm10, %v1757_v22  ;;  %v1597_v32 = vrot.slane %v1593_v26, 5  ;;  %2383 = vmatmul.mubr.msk.f32.vlgmr.msra.gmra.mrb[8].mxu1 %vm581_vm1, %v1785_v25  ;;  %v1582_v59 = vrot.slane %v1578_v28, 5  ;;  %v3019_v31 = vrot.slane %v1108_v3, %v1114_v11  ;;  %v3027_v48 = vrot.slane %v1108_v3, %v1226_v21  ;;  %v3041_v11 = vld [vmem:[%s3306_s7] ss:$0 sm:$0xff] }
  0x70   : > { %1762 = vst.msk [vmem:[#allocation3 + $0x16] sm:$0xfc] %vm1761_vm9, %v1756_v35  ;;  %v1598_v52 = vrot.slane %v1594_v29, 5  ;;  %2388 = vmatprep.subr.msk.mxu1 %vm1256_vm5, %v1935_v15  ;;  %v3031_v50 = vrot.slane %v1108_v3, %v1131_v9  ;;  %v3035_v53 = vrot.slane %v1108_v3, %v1154_v13  ;;  %v3049_v21 = vrot.slane %v1108_v3, %v1250_v36 }
  0x71   : > { %v1602_v4 = vadd.f32 %v1597_v32, %v2947_v24  ;;  %v1583_v10 = vsel %vm1281_vm6, %v1581_v57, %v1582_v59  ;;  %2389 = vmatpush3.msk.msra.mxu1 %vm1256_vm5, %v1935_v15  ;;  %v3053_v9 = vrot.slane %v1108_v3, %v1275_v44 }
  0x72   : > { %v1599_v6 = vsel %vm1281_vm6, %v1597_v32, %v1598_v52  ;;  %v1587_v38 = vadd.f32 %v1583_v10, %v1569_v62 }
  0x73   : > { %1608 = vst.msk [vmem:[#allocation3 + $0xc] sm:$0xf0] %vm1607_vm11, %v1602_v4 }
  0x74   : > { %v1603_v34 = vadd.f32 %v1599_v6, %v1587_v38 }
  0x76   : > { %1610 = vst.msk [vmem:[#allocation3 + $0x14] sm:$0xf] %vm1609_vm12, %v1603_v34 }
  0x77   : > { %v1769_v24 = vld [vmem:[#allocation3 + $0x18] sm:$0xff] }
  0x78   : > { %v1778_v39 = vmul.f32 %v2241_v47, %v1769_v24 }
  0x7a   : > { %v1787_v40 = vadd.f32 %v2242_v63, %v1778_v39 }
  0x7d   : > { %v1768_v57 = vld [vmem:[#allocation3 + $0x10] sm:$0xff] }
  0x7e   : > { %v1777_v12 = vmul.f32 %v2241_v47, %v1768_v57  ;;  %v3023_v47 = vrot.slane %v1108_v3, %v1178_v14  ;;  %v3045_v14 = vrot.slane %v1108_v3, %v1203_v17 }
  0x80   : > { %v1786_v23 = vadd.f32 %v2242_v63, %v1777_v12 }
  0x82   : > { %2385 = vmatprep.mubr.msk.f32.mxu1 %vm581_vm1, %v1786_v23 }
  0x83   : > { %2386 = vmatmul.mubr.msk.f32.gmra.mrb[10].mxu1 %vm581_vm1, %v1787_v40 }
  0x9e   : > { %v2996_v49 = vpop.permute.xlu1 %2457 }
  0x9f   : > { %v2987_v33 = vpop.permute.xlu0 %2446  ;;  %v2460_v54 = vunpack.i.h.bf16 %v2996_v49  ;;  %v2459_v13 = vunpack.i.l.bf16 %v2996_v49 }
  0xa0   : > { %v2449_v55 = vunpack.i.h.bf16 %v2987_v33  ;;  %v2448_v56 = vunpack.i.l.bf16 %v2987_v33 }
  0xa2   : > { %v3000_v37 = vpop.permute.xlu1 %2462 }
  0xa3   : > { %v2998_v51 = vpop.permute.xlu0 %2451  ;;  %v2465_v58 = vunpack.i.h.bf16 %v3000_v37  ;;  %v2464_v17 = vunpack.i.l.bf16 %v3000_v37 }
  0xa4   : > { %v2454_v61 = vunpack.i.h.bf16 %v2998_v51  ;;  %v2453_v36 = vunpack.i.l.bf16 %v2998_v51 }
  0xa6   : > { %v3004_v41 = vpop.permute.xlu1 %2472 }
  0xa7   : > { %v3002_v20 = vpop.permute.xlu0 %2467  ;;  %v2475_v44 = vunpack.i.h.bf16 %v3004_v41  ;;  %v2474_v2 = vunpack.i.l.bf16 %v3004_v41 }
  0xaa   : > { %v3013_v45 = vpop.permute.xlu1 %2482 }
  0xab   : > { %v3006_v43 = vpop.permute.xlu0 %2477  ;;  %v2484_v42 = vunpack.i.l.bf16 %v3013_v45 }
  0xac   : > { %v2480_v7 = vunpack.i.h.bf16 %v3006_v43  ;;  %v2479_v30 = vunpack.i.l.bf16 %v3006_v43 }
  0xae   : > { %v3059_v60 = vpop.permute.xlu1 %2492 }
  0xaf   : > { %v3015_v46 = vpop.permute.xlu0 %2487  ;;  %v2495_v25 = vunpack.i.h.bf16 %v3059_v60  ;;  %v2494_v32 = vunpack.i.l.bf16 %v3059_v60 }
  0xb0   : > { %v2490_v37 = vunpack.i.h.bf16 %v3015_v46 }
  0xb3   : > { %v3070_v63 = vpop.permute.xlu0 %2497 }
  0xec   : > { %v2354_v27 = vpop.f32.mrb[0].mxu0  ;;  %v2374_v1 = vpop.f32.mrb[0].mxu1 }
  0xed   : > { %v779_v0 = vmul.f32 %v2354_v27, %v3041_v11  ;;  %v662_v5 = vpop.f32.mrb[1].mxu0  ;;  %v799_v18 = vmul.f32 %v2374_v1, %v3041_v11  ;;  %v742_v19 = vpop.f32.mrb[1].mxu1 }
  0xee   : > { %v777_v16 = vmul.f32 %v3041_v11, %v662_v5  ;;  %v2355_v22 = vpop.f32.mrb[2].mxu0  ;;  %v797_v35 = vmul.f32 %v3041_v11, %v742_v19  ;;  %v2375_v29 = vpop.f32.mrb[2].mxu1 }
  0xef   : > { %v811_v26 = vadd.f32 %v3067_v8, %v779_v0  ;;  %v780_v28 = vmul.f32 %v2355_v22, %v3041_v11  ;;  %v665_v62 = vpop.f32.mrb[3].mxu0  ;;  %v831_v15 = vadd.f32 %v3067_v8, %v799_v18  ;;  %v800_v52 = vmul.f32 %v2375_v29, %v3041_v11  ;;  %v745_v4 = vpop.f32.mrb[3].mxu1 }
  0xf0   : > { %v809_v59 = vadd.f32 %v3067_v8, %v777_v16  ;;  %v778_v33 = vmul.f32 %v3041_v11, %v665_v62  ;;  %v829_v6 = vadd.f32 %v3067_v8, %v797_v35  ;;  %v798_v34 = vmul.f32 %v3041_v11, %v745_v4  ;;  %v3094_v27 = vpop.permute.xlu1 %2502  ;;  %v3096_v19 = vpop.permute.xlu0 %2507 }
  0xf1   : > { %v838_v10 = vmax.f32 %v811_v26, 0.0  ;;  %v812_v38 = vadd.f32 %v3067_v8, %v780_v28  ;;  %v858_v24 = vmax.f32 %v831_v15, 0.0  ;;  %v832_v57 = vadd.f32 %v3067_v8, %v800_v52 }
  0xf2   : > { %v836_v39 = vmax.f32 %v809_v59, 0.0  ;;  %v810_v12 = vadd.f32 %v3067_v8, %v778_v33  ;;  %v856_v23 = vmax.f32 %v829_v6, 0.0  ;;  %v830_v3 = vadd.f32 %v3067_v8, %v798_v34 }
  0xf3   : > { %v1054_v40 = vmul.f32 %v2453_v36, %v838_v10  ;;  %v839_v43 = vmax.f32 %v812_v38, 0.0  ;;  %v859_v1 = vmax.f32 %v832_v57, 0.0  ;;  %v1074_v18 = vmul.f32 %v2480_v7, %v858_v24 }
  0xf4   : > { %v1052_v0 = vmul.f32 %v2448_v56, %v836_v39  ;;  %v837_v5 = vmax.f32 %v810_v12, 0.0  ;;  %v2358_v16 = vpop.f32.mrb[4].mxu0  ;;  %v1072_v22 = vmul.f32 %v2475_v44, %v856_v23  ;;  %v857_v35 = vmax.f32 %v830_v3, 0.0  ;;  %v2378_v28 = vpop.f32.mrb[4].mxu1 }
  0xf5   : > { %1081 = vst.msk [vmem:[#allocation2 + $0x10] sm:$0xff] %vm581_vm1, %v1054_v40  ;;  %v1055_v26 = vmul.f32 %v2464_v17, %v839_v43  ;;  %v783_v36 = vmul.f32 %v2358_v16, %v3041_v11  ;;  %v678_v29 = vpop.f32.mrb[5].mxu0  ;;  %1101 = vst.msk [vmem:[#allocation2 + $0xb0] sm:$0xff] %vm581_vm1, %v1074_v18  ;;  %v803_v56 = vmul.f32 %v2378_v28, %v3041_v11  ;;  %v758_v59 = vpop.f32.mrb[5].mxu1  ;;  %v2509_v3 = vunpack.i.l.bf16 %v3096_v19 }
  0xf6   : > { %1079 = vst.msk [vmem:[#allocation2] sm:$0xff] %vm581_vm1, %v1052_v0  ;;  %v1053_v62 = vmul.f32 %v2449_v55, %v837_v5  ;;  %v1075_v7 = vmul.f32 %v2494_v32, %v859_v1  ;;  %v781_v15 = vmul.f32 %v3041_v11, %v678_v29  ;;  %v2359_v52 = vpop.f32.mrb[6].mxu0  ;;  %1099 = vst.msk [vmem:[#allocation2 + $0xa0] sm:$0xff] %vm581_vm1, %v1072_v22  ;;  %v2379_v10 = vpop.f32.mrb[6].mxu1  ;;  %v2470_v22 = vunpack.i.h.bf16 %v3002_v20 }
  0xf7   : > { %1082 = vst.msk [vmem:[#allocation2 + $0x18] sm:$0xff] %vm581_vm1, %v1055_v26  ;;  %v1073_v17 = vmul.f32 %v2479_v30, %v857_v35  ;;  %v815_v44 = vadd.f32 %v3067_v8, %v783_v36  ;;  %v801_v33 = vmul.f32 %v3041_v11, %v758_v59  ;;  %v784_v55 = vmul.f32 %v2359_v52, %v3041_v11  ;;  %v681_v4 = vpop.f32.mrb[7].mxu0  ;;  %v761_v34 = vpop.f32.mrb[7].mxu1 }
  0xf8   : > { %1080 = vst.msk [vmem:[#allocation2 + $0x8] sm:$0xff] %vm581_vm1, %v1053_v62  ;;  %v835_v32 = vadd.f32 %v3067_v8, %v803_v56  ;;  %1102 = vst.msk [vmem:[#allocation2 + $0xb8] sm:$0xff] %vm581_vm1, %v1075_v7  ;;  %v813_v6 = vadd.f32 %v3067_v8, %v781_v15  ;;  %v782_v38 = vmul.f32 %v3041_v11, %v681_v4  ;;  %v2504_v30 = vunpack.i.l.bf16 %v3094_v27  ;;  %v1050_v40 = vpop.permute.xlu1 %1049 }
  0xf9   : > { %1100 = vst.msk [vmem:[#allocation2 + $0xa8] sm:$0xff] %vm581_vm1, %v1073_v17  ;;  %v842_v24 = vmax.f32 %v815_v44, 0.0  ;;  %v833_v39 = vadd.f32 %v3067_v8, %v801_v33  ;;  %v816_v57 = vadd.f32 %v3067_v8, %v784_v55  ;;  %v802_v12 = vmul.f32 %v3041_v11, %v761_v34 }
  0xfa   : > { %v840_v23 = vmax.f32 %v813_v6, 0.0  ;;  %v814_v43 = vadd.f32 %v3067_v8, %v782_v38  ;;  %v862_v0 = vmax.f32 %v835_v32, 0.0  ;;  %v2469_v15 = vunpack.i.l.bf16 %v3002_v20 }
  0xfb   : > { %v1058_v1 = vmul.f32 %v2454_v61, %v842_v24  ;;  %v860_v5 = vmax.f32 %v833_v39, 0.0  ;;  %v843_v18 = vmax.f32 %v816_v57, 0.0  ;;  %v834_v16 = vadd.f32 %v3067_v8, %v802_v12 }
  0xfc   : > { %v1056_v26 = vmul.f32 %v2484_v42, %v840_v23  ;;  %v841_v35 = vmax.f32 %v814_v43, 0.0  ;;  %v2362_v36 = vpop.f32.mrb[8].mxu0  ;;  %v1078_v28 = vmul.f32 %v1050_v40, %v862_v0  ;;  %v2485_v59 = vunpack.i.h.bf16 %v3013_v45 }
  0xfd   : > { %v1118_v29 = vld [vmem:[#allocation2] sm:$0xff]  ;;  %1085 = vst.msk [vmem:[#allocation2 + $0x30] sm:$0xff] %vm581_vm1, %v1058_v1  ;;  %v1059_v62 = vmul.f32 %v2459_v13, %v843_v18  ;;  %v1076_v51 = vmul.f32 %v2504_v30, %v860_v5  ;;  %v861_v61 = vmax.f32 %v834_v16, 0.0  ;;  %v787_v56 = vmul.f32 %v2362_v36, %v3041_v11  ;;  %v694_v7 = vpop.f32.mrb[9].mxu0 }
  0xfe   : > { %1083 = vst.msk [vmem:[#allocation2 + $0x20] sm:$0xff] %vm581_vm1, %v1056_v26  ;;  %v1057_v42 = vmul.f32 %v2495_v25, %v841_v35  ;;  %v785_v52 = vmul.f32 %v3041_v11, %v694_v7  ;;  %v2363_v17 = vpop.f32.mrb[10].mxu0  ;;  %1105 = vst.msk [vmem:[#allocation2 + $0xd0] sm:$0xff] %vm581_vm1, %v1078_v28  ;;  %v2489_v55 = vunpack.i.l.bf16 %v3015_v46  ;;  %v2505_v4 = vunpack.i.h.bf16 %v3094_v27  ;;  %v1190_v39 = vld [vmem:[#allocation2 + $0x12] sm:$0xff]  ;;  %v2250_v27 = vld [vmem:[%s3308_s9] ss:$0 sm:$0xff] }
  0xff   : > { %v1143_v13 = vld [vmem:[#allocation2 + $0x9] sm:$0xff]  ;;  %v1165_v44 = vld [vmem:[#allocation2 + $0x1] sm:$0xff]  ;;  %v1672_v33 = vld [vmem:[#allocation2 + $0xb4] sm:$0xff]  ;;  %1086 = vst.msk [vmem:[#allocation2 + $0x38] sm:$0xff] %vm581_vm1, %v1059_v62  ;;  %v819_v45 = vadd.f32 %v3067_v8, %v787_v56  ;;  %v1077_v60 = vmul.f32 %v2509_v3, %v861_v61  ;;  %v697_v25 = vpop.f32.mrb[11].mxu0  ;;  %v1123_v10 = vmul.f32 %v3019_v31, %v1118_v29  ;;  %v2500_v34 = vunpack.i.h.bf16 %v3070_v63 }
 0x100   : > { %1103 = vst.msk [vmem:[#allocation2 + $0xc0] sm:$0xff] %vm581_vm1, %v1076_v51  ;;  %v1148_v32 = vmul.f32 %v3031_v50, %v1143_v13  ;;  %v1620_v6 = vld [vmem:[#allocation2 + $0xa2] sm:$0xff]  ;;  %v1638_v38 = vld [vmem:[#allocation2 + $0xab] sm:$0xff]  ;;  %1084 = vst.msk [vmem:[#allocation2 + $0x28] sm:$0xff] %vm581_vm1, %v1057_v42  ;;  %v817_v24 = vadd.f32 %v3067_v8, %v785_v52  ;;  %v1170_v0 = vmul.f32 %v3035_v53, %v1165_v44 }
 0x101   : > { %v1654_v30 = vld [vmem:[#allocation2 + $0xa3] sm:$0xff]  ;;  %v1621_v57 = vmul.f32 %v1620_v6, %v3019_v31  ;;  %v1639_v12 = vmul.f32 %v1638_v38, %v3031_v50  ;;  %v846_v23 = vmax.f32 %v819_v45, 0.0  ;;  %1104 = vst.msk [vmem:[#allocation2 + $0xc8] sm:$0xff] %vm581_vm1, %v1077_v60  ;;  %v1237_v43 = vld [vmem:[#allocation2 + $0x13] sm:$0xff]  ;;  %v788_v18 = vmul.f32 %v2363_v17, %v3041_v11 }
 0x102   : > { %v1655_v40 = vmul.f32 %v1654_v30, %v3035_v53  ;;  %v1149_v3 = vadd.f32 %v1148_v32, %v1123_v10  ;;  %v1706_v1 = vld [vmem:[#allocation2 + $0xb5] sm:$0xff]  ;;  %v844_v5 = vmax.f32 %v817_v24, 0.0  ;;  %v1673_v26 = vmul.f32 %v1672_v33, %v3023_v47 }
 0x103   : > { %v1640_v16 = vadd.f32 %v1639_v12, %v1621_v57  ;;  %v1062_v35 = vmul.f32 %v2485_v59, %v846_v23  ;;  %v786_v36 = vmul.f32 %v3041_v11, %v697_v25  ;;  %v1195_v28 = vmul.f32 %v3023_v47, %v1190_v39  ;;  %v3165_v59 = vld [vmem:[%s3307_s8 + $0x8] ss:$0 sm:$0xff] }
 0x104   : > { %v1171_v29 = vadd.f32 %v1170_v0, %v1149_v3  ;;  %v1060_v62 = vmul.f32 %v2460_v54, %v844_v5  ;;  %v820_v51 = vadd.f32 %v3067_v8, %v788_v18  ;;  %v2366_v61 = vpop.f32.mrb[12].mxu0  ;;  %v1242_v56 = vmul.f32 %v3027_v48, %v1237_v43 }
 0x105   : > { %v1656_v7 = vadd.f32 %v1655_v40, %v1640_v16  ;;  %v1707_v42 = vmul.f32 %v1706_v1, %v3027_v48  ;;  %v1215_v52 = vld [vmem:[#allocation2 + $0x1b] sm:$0xff]  ;;  %1089 = vst.msk [vmem:[#allocation2 + $0x50] sm:$0xff] %vm581_vm1, %v1062_v35  ;;  %v818_v17 = vadd.f32 %v3067_v8, %v786_v36  ;;  %v710_v49 = vpop.f32.mrb[13].mxu0  ;;  %v791_v25 = vmul.f32 %v2366_v61, %v3041_v11 }
 0x106   : > { %v1196_v54 = vadd.f32 %v1195_v28, %v1171_v29  ;;  %v1220_v13 = vmul.f32 %v3045_v14, %v1215_v52  ;;  %v1326_v44 = vld [vmem:[#allocation2 + $0x36] sm:$0xff]  ;;  %1087 = vst.msk [vmem:[#allocation2 + $0x40] sm:$0xff] %vm581_vm1, %v1060_v62  ;;  %v847_v60 = vmax.f32 %v820_v51, 0.0  ;;  %v2367_v10 = vpop.f32.mrb[14].mxu0  ;;  %v789_v57 = vmul.f32 %v3041_v11, %v710_v49 }
 0x107   : > { %v1360_v33 = vld [vmem:[#allocation2 + $0x37] sm:$0xff]  ;;  %v1674_v32 = vadd.f32 %v1673_v26, %v1656_v7  ;;  %v1327_v6 = vmul.f32 %v1326_v44, %v3019_v31  ;;  %v1262_v38 = vld [vmem:[#allocation2 + $0x24] sm:$0xff]  ;;  %v1287_v30 = vld [vmem:[#allocation2 + $0x2d] sm:$0xff]  ;;  %v713_v12 = vpop.f32.mrb[15].mxu0  ;;  %v845_v28 = vmax.f32 %v818_v17, 0.0  ;;  %v823_v62 = vadd.f32 %v3067_v8, %v791_v25 }
 0x108   : > { %v1690_v45 = vld [vmem:[#allocation2 + $0xbd] sm:$0xff]  ;;  %v1309_v24 = vld [vmem:[#allocation2 + $0x25] sm:$0xff]  ;;  %v1221_v40 = vadd.f32 %v1220_v13, %v1196_v54  ;;  %v1361_v23 = vmul.f32 %v1360_v33, %v3035_v53  ;;  %v1267_v43 = vmul.f32 %v3049_v21, %v1262_v38  ;;  %v1292_v3 = vmul.f32 %v3053_v9, %v1287_v30  ;;  %v1742_v1 = vld [vmem:[#allocation2 + $0xcf] sm:$0xff] }
 0x109   : > { %v1691_v39 = vmul.f32 %v1690_v45, %v3045_v14  ;;  %v1724_v0 = vld [vmem:[#allocation2 + $0xc6] sm:$0xff]  ;;  %v1314_v5 = vmul.f32 %v3165_v59, %v1309_v24  ;;  %v1063_v35 = vmul.f32 %v2489_v55, %v847_v60  ;;  %v1743_v29 = vmul.f32 %v1742_v1, %v3053_v9 }
 0x10a   : > { %v1725_v16 = vmul.f32 %v1724_v0, %v3049_v21  ;;  %v1758_v26 = vld [vmem:[#allocation2 + $0xc7] sm:$0xff]  ;;  %v1243_v36 = vadd.f32 %v1242_v56, %v1221_v40  ;;  %v821_v61 = vadd.f32 %v3067_v8, %v789_v57  ;;  %v792_v7 = vmul.f32 %v2367_v10, %v3041_v11 }
 0x10b   : > { %v1692_v18 = vadd.f32 %v1691_v39, %v1674_v32  ;;  %1090 = vst.msk [vmem:[#allocation2 + $0x58] sm:$0xff] %vm581_vm1, %v1063_v35  ;;  %v790_v52 = vmul.f32 %v3041_v11, %v713_v12  ;;  %v1759_v54 = vmul.f32 %v3165_v59, %v1758_v26  ;;  %v1061_v55 = vmul.f32 %v2474_v2, %v845_v28 }
 0x10c   : > { %v1268_v49 = vadd.f32 %v1267_v43, %v1243_v36  ;;  %v850_v56 = vmax.f32 %v823_v62, 0.0  ;;  %v2370_v17 = vpop.f32.mrb[16].mxu0  ;;  %v848_v33 = vmax.f32 %v821_v61, 0.0  ;;  %v824_v45 = vadd.f32 %v3067_v8, %v792_v7 }
 0x10d   : > { %v1708_v51 = vadd.f32 %v1707_v42, %v1692_v18  ;;  %v1344_v13 = vld [vmem:[#allocation2 + $0x3f] sm:$0xff]  ;;  %v822_v42 = vadd.f32 %v3067_v8, %v790_v52  ;;  %v726_v60 = vpop.f32.mrb[17].mxu0  ;;  %1088 = vst.msk [vmem:[#allocation2 + $0x48] sm:$0xff] %vm581_vm1, %v1061_v55  ;;  %v795_v41 = vmul.f32 %v2370_v17, %v3041_v11  ;;  %v2510_v26 = vunpack.i.h.bf16 %v3096_v19 }
 0x10e   : > { %v1293_v25 = vadd.f32 %v1292_v3, %v1268_v49  ;;  %v1345_v10 = vmul.f32 %v1344_v13, %v3031_v50  ;;  %v1066_v32 = vmul.f32 %v2469_v15, %v850_v56  ;;  %v2371_v2 = vpop.f32.mrb[18].mxu0  ;;  %v1064_v30 = vmul.f32 %v2500_v34, %v848_v33  ;;  %v2251_v52 = vld [vmem:[%s3308_s9 + $0x1] ss:$0 sm:$0xff] }
 0x10f   : > { %v1726_v44 = vadd.f32 %v1725_v16, %v1708_v51  ;;  %v851_v24 = vmax.f32 %v824_v45, 0.0  ;;  %v849_v39 = vmax.f32 %v822_v42, 0.0  ;;  %v729_v57 = vpop.f32.mrb[19].mxu0  ;;  %v827_v43 = vadd.f32 %v3067_v8, %v795_v41 }
 0x110   : > { %v1315_v12 = vadd.f32 %v1314_v5, %v1293_v25  ;;  %v1346_v40 = vadd.f32 %v1345_v10, %v1327_v6  ;;  %1093 = vst.msk [vmem:[#allocation2 + $0x70] sm:$0xff] %vm581_vm1, %v1066_v32  ;;  %v793_v3 = vmul.f32 %v3041_v11, %v726_v60  ;;  %1091 = vst.msk [vmem:[#allocation2 + $0x60] sm:$0xff] %vm581_vm1, %v1064_v30  ;;  %v2499_v28 = vunpack.i.l.bf16 %v3070_v63 }
 0x111   : > { %v1744_v38 = vadd.f32 %v1743_v29, %v1726_v44  ;;  %v1067_v15 = vmul.f32 %v2470_v22, %v851_v24  ;;  %v1065_v34 = vmul.f32 %v2465_v58, %v849_v39  ;;  %v796_v1 = vmul.f32 %v2371_v2, %v3041_v11 }
 0x112   : > { %1317 = vst.msk [vmem:[#allocation4] sm:$0xff] %vm581_vm1, %v1315_v12  ;;  %v1362_v6 = vadd.f32 %v1361_v23, %v1346_v40  ;;  %v854_v5 = vmax.f32 %v827_v43, 0.0  ;;  %v825_v18 = vadd.f32 %v3067_v8, %v793_v3  ;;  %v794_v16 = vmul.f32 %v3041_v11, %v729_v57  ;;  %v1389_v35 = vld [vmem:[#allocation2 + $0x51] sm:$0xff] }
 0x113   : > { %v1760_v0 = vadd.f32 %v1759_v54, %v1744_v38  ;;  %1094 = vst.msk [vmem:[#allocation2 + $0x78] sm:$0xff] %vm581_vm1, %v1067_v15  ;;  %1092 = vst.msk [vmem:[#allocation2 + $0x68] sm:$0xff] %vm581_vm1, %v1065_v34  ;;  %v828_v20 = vadd.f32 %v3067_v8, %v796_v1 }
 0x114   : > { %v1070_v58 = vmul.f32 %v2505_v4, %v854_v5  ;;  %v852_v22 = vmax.f32 %v825_v18, 0.0  ;;  %v826_v23 = vadd.f32 %v3067_v8, %v794_v16  ;;  %v1371_v11 = vld [vmem:[#allocation2 + $0x48] sm:$0xff]  ;;  %v1390_v8 = vmul.f32 %v1389_v35, %v3045_v14 }
 0x115   : > { %1765 = vst.msk [vmem:[#allocation4 + $0x18] sm:$0xff] %vm581_vm1, %v1760_v0  ;;  %v855_v36 = vmax.f32 %v828_v20, 0.0  ;;  %v1372_v29 = vmul.f32 %v1371_v11, %v3023_v47  ;;  %v1405_v46 = vld [vmem:[#allocation2 + $0x49] sm:$0xff] }
 0x116   : > { %1097 = vst.msk [vmem:[#allocation2 + $0x90] sm:$0xff] %vm581_vm1, %v1070_v58  ;;  %v1068_v62 = vmul.f32 %v2490_v37, %v852_v22  ;;  %v853_v51 = vmax.f32 %v826_v23, 0.0  ;;  %v1406_v54 = vmul.f32 %v1405_v46, %v3027_v48 }
 0x117   : > { %v1071_v61 = vmul.f32 %v2510_v26, %v855_v36  ;;  %v1373_v19 = vadd.f32 %v1372_v29, %v1362_v6  ;;  %v1423_v7 = vld [vmem:[#allocation2 + $0x5a] sm:$0xff] }
 0x118   : > { %1095 = vst.msk [vmem:[#allocation2 + $0x80] sm:$0xff] %vm581_vm1, %v1068_v62  ;;  %v1069_v4 = vmul.f32 %v2499_v28, %v853_v51  ;;  %v1424_v60 = vmul.f32 %v1423_v7, %v3049_v21  ;;  %v1457_v10 = vld [vmem:[#allocation2 + $0x5b] sm:$0xff] }
 0x119   : > { %1098 = vst.msk [vmem:[#allocation2 + $0x98] sm:$0xff] %vm581_vm1, %v1071_v61  ;;  %v1912_v63 = vld [vmem:[#allocation4] sm:$0xff]  ;;  %v1391_v49 = vadd.f32 %v1390_v8, %v1373_v19  ;;  %v2249_v36 = vld [vmem:[%s3304_s5 + $0x1] ss:$0 sm:$0xff] }
 0x11a   : > { %v1491_v55 = vld [vmem:[#allocation2 + $0x75] sm:$0xff]  ;;  %v1473_v56 = vld [vmem:[#allocation2 + $0x6c] sm:$0xff]  ;;  %1096 = vst.msk [vmem:[#allocation2 + $0x88] sm:$0xff] %vm581_vm1, %v1069_v4  ;;  %v1921_v17 = vmul.f32 %v2250_v27, %v1912_v63  ;;  %v1441_v44 = vld [vmem:[#allocation2 + $0x63] sm:$0xff] }
 0x11b   : > { %v1492_v13 = vmul.f32 %v1491_v55, %v3031_v50  ;;  %v1474_v33 = vmul.f32 %v1473_v56, %v3019_v31  ;;  %v1507_v45 = vld [vmem:[#allocation2 + $0x6d] sm:$0xff]  ;;  %v1407_v42 = vadd.f32 %v1406_v54, %v1391_v49  ;;  %v1442_v38 = vmul.f32 %v1441_v44, %v3053_v9  ;;  %v2257_v55 = vld [vmem:[%s3310_s11] ss:$0 sm:$0xff] }
 0x11c   : > { %v1930_v25 = vadd.f32 %v2251_v52, %v1921_v17  ;;  %v1508_v41 = vmul.f32 %v1507_v45, %v3035_v53  ;;  %v1458_v50 = vmul.f32 %v3165_v59, %v1457_v10  ;;  %v2258_v17 = vld [vmem:[%s3310_s11 + $0x1] ss:$0 sm:$0xff] }
 0x11d   : > { %v1493_v32 = vadd.f32 %v1492_v13, %v1474_v33  ;;  %v1425_v2 = vadd.f32 %v1424_v60, %v1407_v42  ;;  %v1570_v0 = vld [vmem:[#allocation2 + $0x90] sm:$0xff] }
 0x11e   : > { %2390 = vmatprep.mubr.msk.f32.mxu1 %vm581_vm1, %v1930_v25  ;;  %v1571_v1 = vmul.f32 %v1570_v0, %v3049_v21 }
 0x11f   : > { %v1509_v30 = vadd.f32 %v1508_v41, %v1493_v32  ;;  %v1525_v24 = vld [vmem:[#allocation2 + $0x7e] sm:$0xff]  ;;  %v1443_v39 = vadd.f32 %v1442_v38, %v1425_v2 }
 0x120   : > { %v1526_v31 = vmul.f32 %v1525_v24, %v3023_v47  ;;  %v1559_v57 = vld [vmem:[#allocation2 + $0x7f] sm:$0xff]  ;;  %v1604_v5 = vld [vmem:[#allocation2 + $0x91] sm:$0xff] }
 0x121   : > { %v1543_v12 = vld [vmem:[#allocation2 + $0x87] sm:$0xff]  ;;  %v1459_v40 = vadd.f32 %v1458_v50, %v1443_v39  ;;  %v1560_v53 = vmul.f32 %v1559_v57, %v3027_v48  ;;  %v1588_v34 = vld [vmem:[#allocation2 + $0x99] sm:$0xff]  ;;  %v1605_v16 = vmul.f32 %v3165_v59, %v1604_v5  ;;  %v1915_v48 = vld [vmem:[#allocation4 + $0x18] sm:$0xff] }
 0x122   : > { %v1527_v43 = vadd.f32 %v1526_v31, %v1509_v30  ;;  %v1544_v3 = vmul.f32 %v1543_v12, %v3045_v14  ;;  %v1589_v18 = vmul.f32 %v1588_v34, %v3053_v9  ;;  %v1924_v23 = vmul.f32 %v2250_v27, %v1915_v48  ;;  %v2248_v59 = vld [vmem:[%s3304_s5] ss:$0 sm:$0xff] }
 0x123   : > { %1464 = vst.msk [vmem:[#allocation4 + $0x8] sm:$0xff] %vm581_vm1, %v1459_v40 }
 0x124   : > { %v1545_v15 = vadd.f32 %v1544_v3, %v1527_v43  ;;  %v1933_v9 = vadd.f32 %v2251_v52, %v1924_v23 }
 0x126   : > { %v1561_v6 = vadd.f32 %v1560_v53, %v1545_v15 }
 0x128   : > { %v1572_v47 = vadd.f32 %v1571_v1, %v1561_v6 }
 0x12a   : > { %v1590_v20 = vadd.f32 %v1589_v18, %v1572_v47  ;;  %v1913_v14 = vld [vmem:[#allocation4 + $0x8] sm:$0xff] }
 0x12b   : > { %v1922_v37 = vmul.f32 %v2250_v27, %v1913_v14 }
 0x12c   : > { %v1606_v58 = vadd.f32 %v1605_v16, %v1590_v20 }
 0x12d   : > { %v1931_v22 = vadd.f32 %v2251_v52, %v1922_v37 }
 0x12e   : > { %1611 = vst.msk [vmem:[#allocation4 + $0x10] sm:$0xff] %vm581_vm1, %v1606_v58 }
 0x12f   : > { %2391 = vmatmul.mubr.msk.f32.vlgmr.msra.gmra.mrb[12].mxu1 %vm581_vm1, %v1931_v22 }
 0x135   : > { %v1914_v21 = vld [vmem:[#allocation4 + $0x10] sm:$0xff] }
 0x136   : > { %v1923_v26 = vmul.f32 %v2250_v27, %v1914_v21 }
 0x138   : > { %v1932_v35 = vadd.f32 %v2251_v52, %v1923_v26 }
 0x13a   : > { %2393 = vmatprep.mubr.msk.f32.mxu1 %vm581_vm1, %v1932_v35 }
 0x13b   : > { %2394 = vmatmul.mubr.msk.f32.gmra.mrb[14].mxu1 %vm581_vm1, %v1933_v9 }
 0x142   : > { %v2384_v11 = vpop.f32.mrb[8].mxu1 }
 0x143   : > { %v1896_v28 = vmul.f32 %v2384_v11, %v2248_v59  ;;  %v1871_v29 = vpop.f32.mrb[9].mxu1 }
 0x144   : > { %v1895_v62 = vmul.f32 %v2248_v59, %v1871_v29 }
 0x145   : > { %v1905_v51 = vadd.f32 %v2249_v36, %v1896_v28 }
 0x146   : > { %v1904_v46 = vadd.f32 %v2249_v36, %v1895_v62 }
 0x147   : > { %v1909_v61 = vmax.f32 %v1905_v51, 0.0 }
 0x148   : > { %v1908_v27 = vmax.f32 %v1904_v46, 0.0 }
 0x149   : > { %2059 = vst.msk [vmem:[%s3264_s21 + $0x8] sm:$0xff] %vm581_vm1, %v1909_v61 }
 0x14a   : > { %2058 = vst.msk [vmem:[%s3264_s21] sm:$0xff] %vm581_vm1, %v1908_v27 }
 0x156   : > { %v2387_v8 = vpop.f32.mrb[10].mxu1 }
 0x157   : > { %v1898_v19 = vmul.f32 %v2387_v8, %v2248_v59  ;;  %v1881_v4 = vpop.f32.mrb[11].mxu1 }
 0x158   : > { %v1897_v7 = vmul.f32 %v2248_v59, %v1881_v4 }
 0x159   : > { %v1907_v63 = vadd.f32 %v2249_v36, %v1898_v19 }
 0x15a   : > { %v1906_v52 = vadd.f32 %v2249_v36, %v1897_v7 }
 0x15b   : > { %v1911_v49 = vmax.f32 %v1907_v63, 0.0 }
 0x15c   : > { %v1910_v54 = vmax.f32 %v1906_v52, 0.0 }
 0x15d   : > { %2061 = vst.msk [vmem:[%s3264_s21 + $0x18] sm:$0xff] %vm581_vm1, %v1911_v49 }
 0x15e   : > { %2060 = vst.msk [vmem:[%s3264_s21 + $0x10] sm:$0xff] %vm581_vm1, %v1910_v54 }
 0x202   : > { %v2392_v56 = vpop.f32.mrb[12].mxu1 }
 0x203   : > { %v2042_v13 = vmul.f32 %v2392_v56, %v2257_v55  ;;  %v2017_v44 = vpop.f32.mrb[13].mxu1 }
 0x204   : > { %v2041_v33 = vmul.f32 %v2257_v55, %v2017_v44 }
 0x205   : > { %v2051_v45 = vadd.f32 %v2258_v17, %v2042_v13 }
 0x206   : > { %v2050_v42 = vadd.f32 %v2258_v17, %v2041_v33 }
 0x207   : > { %v2055_v60 = vmax.f32 %v2051_v45, 0.0 }
 0x208   : > { %v2054_v25 = vmax.f32 %v2050_v42, 0.0 }
 0x209   : > { %2068 = vrot.lane.b32.xlu1 %v2055_v60, %s2566_s15 }
 0x20a   : > { %2066 = vrot.lane.b32.xlu0 %v2054_v25, %s2566_s15 }
 0x20e   : > { %v2395_v10 = vpop.f32.mrb[14].mxu1 }
 0x20f   : > { %v2044_v32 = vmul.f32 %v2395_v10, %v2257_v55  ;;  %v2027_v41 = vpop.f32.mrb[15].mxu1 }
 0x210   : > { %v2043_v2 = vmul.f32 %v2257_v55, %v2027_v41 }
 0x211   : > { %v2053_v38 = vadd.f32 %v2258_v17, %v2044_v32 }
 0x212   : > { %v2052_v30 = vadd.f32 %v2258_v17, %v2043_v2 }
 0x213   : > { %v2057_v24 = vmax.f32 %v2053_v38, 0.0 }
 0x214   : > { %v2056_v50 = vmax.f32 %v2052_v30, 0.0 }
 0x215   : > { %2072 = vrot.lane.b32.xlu1 %v2057_v24, %s2566_s15 }
 0x216   : > { %2070 = vrot.lane.b32.xlu0 %v2056_v50, %s2566_s15 }
 0x27b   : > { %v2069_v39 = vpop.permute.xlu1 %2068 }
 0x27c   : > { %2080 = vst.msk [vmem:[%s3264_s21 + $0x8] sm:$0xff] %vm2078_vm13, %v2069_v39  ;;  %v2067_v31 = vpop.permute.xlu0 %2066 }
 0x27d   : > { %2079 = vst.msk [vmem:[%s3264_s21] sm:$0xff] %vm2078_vm13, %v2067_v31 }
 0x287   : > { %v2073_v57 = vpop.permute.xlu1 %2072 }
 0x288   : > { %2082 = vst.msk [vmem:[%s3264_s21 + $0x18] sm:$0xff] %vm2078_vm13, %v2073_v57  ;;  %v2071_v12 = vpop.permute.xlu0 %2070 }
 0x289   : > { %2081 = vst.msk [vmem:[%s3264_s21 + $0x10] sm:$0xff] %vm2078_vm13, %v2071_v12 }
 0x28a PF: > { %s22_s25 = sadd.s32 1, %s2563_s25   ;;  %s3312_s21 = smov %s2555_s23 }
 0x28b   : > { %p19_p7 = scmp.ge.s32.totalorder %s22_s25, 6   ;;  %s3313_s22 = smov %s2559_s24 }
 0x28c   : > { %s3314_s23 = smov %s3317_s26  ;;  %s3315_s24 = smov %s3321_s27 }
 0x28d   :  { %21 = sbr.rel (!%p19_p7) target bundleno = 3 (0x3), region = 101 }

</bundles_post_ra>
